<compile_context>
chip_gen: v7x
topology: tpu7x:2x2x1
jax: 0.10.0
libtpu: 0.0.40
codegen_flags: <defaults>
</compile_context>

<pallas_src>
import functools

import jax
import jax.numpy as jnp
from jax.experimental import pallas as pl
from jax.experimental.pallas import tpu as pltpu


def _round_up(n, m):
    return ((n + m - 1) // m) * m


# ----------------------------------------------------------------------------
# Fused whole-network forward kernel.
# Input ref order: x, adj_0..adj_{A-1}, then per layer (w, b[, gamma, beta]),
# then w_out_padded, b_out_padded.  Last ref is the (lane-dense) output.
# ----------------------------------------------------------------------------
def _fused_forward_kernel(*refs, layer_list, nhid, eps):
    refs = list(refs)
    o_ref = refs.pop()                       # output (N, C_pad)
    it = iter(refs)
    x_ref = next(it)
    num_adj = sum(1 for lt in layer_list if lt != 0)
    adj_refs = [next(it) for _ in range(num_adj)]
    layer_refs = []
    for lt in layer_list:
        if lt == 2:
            layer_refs.append((next(it), next(it), next(it), next(it)))
        else:
            layer_refs.append((next(it), next(it)))
    wo_ref = next(it)
    bo_ref = next(it)

    H = nhid

    def matmul_parts(parts, w_ref, b_ref):
        # parts: list of (N, d_i) f32 arrays whose concat along -1 is the layer input.
        # Split the weight rows instead of concatenating activations (no lane concat).
        acc = b_ref[...].astype(jnp.float32)            # (1, out), broadcasts over rows
        off = 0
        for p in parts:
            d = p.shape[-1]
            acc = acc + jnp.dot(p, w_ref[off:off + d, :].astype(jnp.float32),
                                preferred_element_type=jnp.float32)
            off += d
        return acc

    # Current activation kept as a list of column blocks (1 block, or 2 after a Sage layer).
    act = [x_ref[...].astype(jnp.float32)]
    a = 0
    for lid, lt in enumerate(layer_list):
        if lt == 2:
            w_ref, b_ref, g_ref, be_ref = layer_refs[lid]
        else:
            w_ref, b_ref = layer_refs[lid]

        z = matmul_parts(act, w_ref, b_ref)              # (N, H) = xW + b

        if lt == 0:
            # nn.Linear -> ReLU
            act = [jnp.maximum(z, 0.0)]
        else:
            adj = adj_refs[a][...].astype(jnp.float32)
            a += 1
            agg = jnp.dot(adj, z, preferred_element_type=jnp.float32)   # adj @ (xW+b)
            if lt == 1:
                # GraphConvolution -> ReLU
                act = [jnp.maximum(agg, 0.0)]
            else:
                # GraphSageConvolution: LayerNorm(concat([z, agg], -1)) -> ReLU.
                # Stats computed over both halves without forming the concat.
                gamma = g_ref[...].astype(jnp.float32)   # (1, 2H)
                beta = be_ref[...].astype(jnp.float32)   # (1, 2H)
                mean = (jnp.sum(z, axis=-1, keepdims=True)
                        + jnp.sum(agg, axis=-1, keepdims=True)) * (1.0 / (2.0 * H))
                zc = z - mean
                ac = agg - mean
                var = (jnp.sum(zc * zc, axis=-1, keepdims=True)
                       + jnp.sum(ac * ac, axis=-1, keepdims=True)) * (1.0 / (2.0 * H))
                inv = jax.lax.rsqrt(var + eps)
                hs = zc * inv * gamma[:, :H] + beta[:, :H]
                hn = ac * inv * gamma[:, H:] + beta[:, H:]
                act = [jnp.maximum(hs, 0.0), jnp.maximum(hn, 0.0)]
        # dropout = identity (eval mode)

    # gc_out: Linear(nhid, num_classes) -- weight/bias padded to lane-dense width.
    out = matmul_parts(act, wo_ref, bo_ref)              # (N, C_pad)
    o_ref[...] = out.astype(o_ref.dtype)


# ----------------------------------------------------------------------------
# Wrapper: builds the flat operand list, full-array VMEM BlockSpecs, one grid step.
# ----------------------------------------------------------------------------
def graphsage_gcn_v3_forward(x, adjs, params, layer_list, *, eps=1e-5):
    N, _ = x.shape
    nhid = params["gcs"][0]["w"].shape[1]
    num_classes = params["out"]["w"].shape[1]

    # Lane-dense output: pad gc_out to a multiple of 128 output lanes, slice afterwards.
    c_pad = _round_up(num_classes, 128)
    wo = jnp.zeros((params["out"]["w"].shape[0], c_pad), jnp.float32)
    wo = wo.at[:, :num_classes].set(params["out"]["w"].astype(jnp.float32))
    bo = jnp.zeros((1, c_pad), jnp.float32)
    bo = bo.at[0, :num_classes].set(params["out"]["b"].astype(jnp.float32))

    num_adj = sum(1 for lt in layer_list if lt != 0)
    assert len(adjs) >= num_adj

    flat = [x.astype(jnp.float32)] + [adjs[i].astype(jnp.float32) for i in range(num_adj)]
    for lid, lt in enumerate(layer_list):
        p = params["gcs"][lid]
        flat += [p["w"].astype(jnp.float32), p["b"].reshape(1, -1).astype(jnp.float32)]
        if lt == 2:
            flat += [p["gamma"].reshape(1, -1).astype(jnp.float32),
                     p["beta"].reshape(1, -1).astype(jnp.float32)]
    flat += [wo, bo]

    def full_spec(arr):
        nd = arr.ndim
        return pl.BlockSpec(arr.shape, lambda i, _nd=nd: (0,) * _nd)

    in_specs = [full_spec(a) for a in flat]
    out_spec = pl.BlockSpec((N, c_pad), lambda i: (0, 0))

    kernel = functools.partial(
        _fused_forward_kernel, layer_list=tuple(layer_list), nhid=nhid, eps=eps)

    out_padded = pl.pallas_call(
        kernel,
        out_shape=jax.ShapeDtypeStruct((N, c_pad), x.dtype),
        grid_spec=pltpu.PrefetchScalarGridSpec(
            num_scalar_prefetch=0,
            grid=(1,),                       # single step: whole working set fits VMEM
            in_specs=in_specs,
            out_specs=out_spec,
        ),
        compiler_params=pltpu.CompilerParams(
            dimension_semantics=("arbitrary",)),
    )(*flat)

    return out_padded[:, :num_classes]


# ----------------------------------------------------------------------------
# Parameter init (matches torch nn.Linear default init; GraphConvolution /
# GraphSageConvolution use an equivalent linear transform for the demo).
# ----------------------------------------------------------------------------
def init_params(key, nfeat, nhid, num_classes, layer_list):
    def linear_init(k, fan_in, fan_out):
        k1, k2 = jax.random.split(k)
        bound = 1.0 / jnp.sqrt(fan_in)
        w = jax.random.uniform(k1, (fan_in, fan_out), jnp.float32, -bound, bound)
        b = jax.random.uniform(k2, (fan_out,), jnp.float32, -bound, bound)
        return w, b

    params = {"gcs": []}
    for lid, ltype in enumerate(layer_list):
        key, sub = jax.random.split(key)
        if lid == 0:
            cur_in = nfeat          # first entry must be 1 or 2 (as in the torch module)
        elif layer_list[lid - 1] == 2:
            cur_in = 2 * nhid
        else:
            cur_in = nhid
        w, b = linear_init(sub, cur_in, nhid)
        p = {"w": w, "b": b}
        if ltype == 2:              # GraphSage LayerNorm affine params over 2*nhid
            p["gamma"] = jnp.ones((2 * nhid,), jnp.float32)
            p["beta"] = jnp.zeros((2 * nhid,), jnp.float32)
        params["gcs"].append(p)
    key, sub = jax.random.split(key)
    wo, bo = linear_init(sub, nhid, num_classes)
    params["out"] = {"w": wo, "b": bo}
    return params


# ----------------------------------------------------------------------------
# Pure-JAX reference (for correctness check).
# ----------------------------------------------------------------------------
def _reference_forward(x, adjs, params, layer_list, eps=1e-5):
    hp = jax.lax.Precision.HIGHEST
    num = 0
    h = x
    for lid, lt in enumerate(layer_list):
        p = params["gcs"][lid]
        z = jnp.dot(h, p["w"], precision=hp) + p["b"]
        if lt == 0:
            h = jax.nn.relu(z)
        else:
            agg = jnp.dot(adjs[num], z, precision=hp)
            num += 1
            if lt == 1:
                h = jax.nn.relu(agg)
            else:
                cat = jnp.concatenate([z, agg], axis=-1)
                mean = jnp.mean(cat, axis=-1, keepdims=True)
                var = jnp.mean((cat - mean) ** 2, axis=-1, keepdims=True)
                y = (cat - mean) * jax.lax.rsqrt(var + eps) * p["gamma"] + p["beta"]
                h = jax.nn.relu(y)
    return jnp.dot(h, params["out"]["w"], precision=hp) + params["out"]["b"]


if __name__ == "__main__":
    N_NODES = 128
    NFEAT = 64
    NHID = 32
    NCLASS = 8
    LAYER_LIST = [2, 1, 0]   # GraphSage -> GraphConv -> Linear

    key = jax.random.PRNGKey(0)
    k_x, k_a0, k_a1, k_p = jax.random.split(key, 4)

    x = jax.random.normal(k_x, (N_NODES, NFEAT), jnp.float32)

    def make_adj(k):
        raw = (jax.random.uniform(k, (N_NODES, N_NODES)) < 0.1).astype(jnp.float32)
        raw = raw + jnp.eye(N_NODES, dtype=jnp.float32)
        deg = jnp.sum(raw, axis=1, keepdims=True)
        return raw / deg  # row-normalized

    adjs = [make_adj(k_a0), make_adj(k_a1)]   # one adj per layer with ltype != 0

    params = init_params(k_p, NFEAT, NHID, NCLASS, LAYER_LIST)

    out = graphsage_gcn_v3_forward(x, adjs, params, LAYER_LIST)
    out = jax.block_until_ready(out)
    assert out.shape == (N_NODES, NCLASS)

    ref = jax.block_until_ready(_reference_forward(x, adjs, params, LAYER_LIST))
    assert jnp.allclose(out, ref, atol=1e-3, rtol=1e-3), (
        float(jnp.max(jnp.abs(out - ref))))

    print("KERNEL_OK")
</pallas_src>

<mosaic_0001>
module attributes {stable_mosaic.version = 11 : i64} {
  func.func @_fused_forward_kernel(%arg0: i32, %arg1: memref<128x64xf32, #tpu.memory_space<vmem>>, %arg2: memref<128x128xf32, #tpu.memory_space<vmem>>, %arg3: memref<128x128xf32, #tpu.memory_space<vmem>>, %arg4: memref<64x32xf32, #tpu.memory_space<vmem>>, %arg5: memref<1x32xf32, #tpu.memory_space<vmem>>, %arg6: memref<1x64xf32, #tpu.memory_space<vmem>>, %arg7: memref<1x64xf32, #tpu.memory_space<vmem>>, %arg8: memref<64x32xf32, #tpu.memory_space<vmem>>, %arg9: memref<1x32xf32, #tpu.memory_space<vmem>>, %arg10: memref<32x32xf32, #tpu.memory_space<vmem>>, %arg11: memref<1x32xf32, #tpu.memory_space<vmem>>, %arg12: memref<32x128xf32, #tpu.memory_space<vmem>>, %arg13: memref<1x128xf32, #tpu.memory_space<vmem>>, %arg14: memref<128x128xf32, #tpu.memory_space<vmem>>) attributes {dimension_semantics = [#tpu.dimension_semantics<arbitrary>], iteration_bounds = array<i64: 1>, scalar_prefetch = 0 : i64, scratch_operands = 0 : i64, tpu.core_type = #tpu.core_type<tc>, window_params = [{pipeline_mode = #tpu.pipeline_mode<synchronous>, transform_indices = @transform_0, window_bounds = array<i64: 128, 64>}, {pipeline_mode = #tpu.pipeline_mode<synchronous>, transform_indices = @transform_1, window_bounds = array<i64: 128, 128>}, {pipeline_mode = #tpu.pipeline_mode<synchronous>, transform_indices = @transform_2, window_bounds = array<i64: 128, 128>}, {pipeline_mode = #tpu.pipeline_mode<synchronous>, transform_indices = @transform_3, window_bounds = array<i64: 64, 32>}, {pipeline_mode = #tpu.pipeline_mode<synchronous>, transform_indices = @transform_4, window_bounds = array<i64: 1, 32>}, {pipeline_mode = #tpu.pipeline_mode<synchronous>, transform_indices = @transform_5, window_bounds = array<i64: 1, 64>}, {pipeline_mode = #tpu.pipeline_mode<synchronous>, transform_indices = @transform_6, window_bounds = array<i64: 1, 64>}, {pipeline_mode = #tpu.pipeline_mode<synchronous>, transform_indices = @transform_7, window_bounds = array<i64: 64, 32>}, {pipeline_mode = #tpu.pipeline_mode<synchronous>, transform_indices = @transform_8, window_bounds = array<i64: 1, 32>}, {pipeline_mode = #tpu.pipeline_mode<synchronous>, transform_indices = @transform_9, window_bounds = array<i64: 32, 32>}, {pipeline_mode = #tpu.pipeline_mode<synchronous>, transform_indices = @transform_10, window_bounds = array<i64: 1, 32>}, {pipeline_mode = #tpu.pipeline_mode<synchronous>, transform_indices = @transform_11, window_bounds = array<i64: 32, 128>}, {pipeline_mode = #tpu.pipeline_mode<synchronous>, transform_indices = @transform_12, window_bounds = array<i64: 1, 128>}, {pipeline_mode = #tpu.pipeline_mode<synchronous>, transform_indices = @transform_13, window_bounds = array<i64: 128, 128>}]} {
    %c0 = arith.constant 0 : index
    %c0_0 = arith.constant 0 : index
    %0 = vector.load %arg1[%c0, %c0_0] : memref<128x64xf32, #tpu.memory_space<vmem>>, vector<128x64xf32>
    %c0_1 = arith.constant 0 : index
    %c0_2 = arith.constant 0 : index
    %1 = vector.load %arg5[%c0_1, %c0_2] : memref<1x32xf32, #tpu.memory_space<vmem>>, vector<1x32xf32>
    %c0_3 = arith.constant 0 : index
    %c0_4 = arith.constant 0 : index
    %2 = vector.load %arg4[%c0_3, %c0_4] : memref<64x32xf32, #tpu.memory_space<vmem>>, vector<64x32xf32>
    %cst = arith.constant dense<0.000000e+00> : vector<128x32xf32>
    %3 = tpu.matmul %0, %2, %cst {dimension_numbers = #tpu.dot_dimension_numbers<[1], [0], [0], [1], [0, 0, 1, 1], [], []>} : vector<128x64xf32>, vector<64x32xf32>, vector<128x32xf32> -> vector<128x32xf32>
    %4 = vector.broadcast %1 : vector<1x32xf32> to vector<128x32xf32>
    %5 = arith.addf %4, %3 : vector<128x32xf32>
    %c0_5 = arith.constant 0 : index
    %c0_6 = arith.constant 0 : index
    %6 = vector.load %arg2[%c0_5, %c0_6] : memref<128x128xf32, #tpu.memory_space<vmem>>, vector<128x128xf32>
    %cst_7 = arith.constant dense<0.000000e+00> : vector<128x32xf32>
    %7 = tpu.matmul %6, %5, %cst_7 {dimension_numbers = #tpu.dot_dimension_numbers<[1], [0], [0], [1], [0, 0, 1, 1], [], []>} : vector<128x128xf32>, vector<128x32xf32>, vector<128x32xf32> -> vector<128x32xf32>
    %c0_8 = arith.constant 0 : index
    %c0_9 = arith.constant 0 : index
    %8 = vector.load %arg6[%c0_8, %c0_9] : memref<1x64xf32, #tpu.memory_space<vmem>>, vector<1x64xf32>
    %c0_10 = arith.constant 0 : index
    %c0_11 = arith.constant 0 : index
    %9 = vector.load %arg7[%c0_10, %c0_11] : memref<1x64xf32, #tpu.memory_space<vmem>>, vector<1x64xf32>
    %cst_12 = arith.constant dense<0.000000e+00> : vector<128xf32>
    %10 = vector.multi_reduction <add>, %5, %cst_12 [1] : vector<128x32xf32> to vector<128xf32>
    %11 = vector.shape_cast %10 : vector<128xf32> to vector<128x1xf32>
    %cst_13 = arith.constant dense<0.000000e+00> : vector<128xf32>
    %12 = vector.multi_reduction <add>, %7, %cst_13 [1] : vector<128x32xf32> to vector<128xf32>
    %13 = vector.shape_cast %12 : vector<128xf32> to vector<128x1xf32>
    %14 = arith.addf %11, %13 : vector<128x1xf32>
    %cst_14 = arith.constant 1.562500e-02 : f32
    %15 = vector.broadcast %cst_14 : f32 to vector<128x1xf32>
    %16 = arith.mulf %14, %15 : vector<128x1xf32>
    %17 = vector.broadcast %16 : vector<128x1xf32> to vector<128x32xf32>
    %18 = arith.subf %5, %17 : vector<128x32xf32>
    %19 = vector.broadcast %16 : vector<128x1xf32> to vector<128x32xf32>
    %20 = arith.subf %7, %19 : vector<128x32xf32>
    %21 = arith.mulf %18, %18 : vector<128x32xf32>
    %cst_15 = arith.constant dense<0.000000e+00> : vector<128xf32>
    %22 = vector.multi_reduction <add>, %21, %cst_15 [1] : vector<128x32xf32> to vector<128xf32>
    %23 = vector.shape_cast %22 : vector<128xf32> to vector<128x1xf32>
    %24 = arith.mulf %20, %20 : vector<128x32xf32>
    %cst_16 = arith.constant dense<0.000000e+00> : vector<128xf32>
    %25 = vector.multi_reduction <add>, %24, %cst_16 [1] : vector<128x32xf32> to vector<128xf32>
    %26 = vector.shape_cast %25 : vector<128xf32> to vector<128x1xf32>
    %27 = arith.addf %23, %26 : vector<128x1xf32>
    %cst_17 = arith.constant 1.562500e-02 : f32
    %28 = vector.broadcast %cst_17 : f32 to vector<128x1xf32>
    %29 = arith.mulf %27, %28 : vector<128x1xf32>
    %cst_18 = arith.constant 9.99999974E-6 : f32
    %30 = vector.broadcast %cst_18 : f32 to vector<128x1xf32>
    %31 = arith.addf %29, %30 : vector<128x1xf32>
    %32 = math.rsqrt %31 : vector<128x1xf32>
    %33 = vector.broadcast %32 : vector<128x1xf32> to vector<128x32xf32>
    %34 = arith.mulf %18, %33 : vector<128x32xf32>
    %35 = vector.extract_strided_slice %8 {offsets = [0, 0], sizes = [1, 32], strides = [1, 1]} : vector<1x64xf32> to vector<1x32xf32>
    %36 = vector.broadcast %35 : vector<1x32xf32> to vector<128x32xf32>
    %37 = arith.mulf %34, %36 : vector<128x32xf32>
    %38 = vector.extract_strided_slice %9 {offsets = [0, 0], sizes = [1, 32], strides = [1, 1]} : vector<1x64xf32> to vector<1x32xf32>
    %39 = vector.broadcast %38 : vector<1x32xf32> to vector<128x32xf32>
    %40 = arith.addf %37, %39 : vector<128x32xf32>
    %41 = vector.broadcast %32 : vector<128x1xf32> to vector<128x32xf32>
    %42 = arith.mulf %20, %41 : vector<128x32xf32>
    %43 = vector.extract_strided_slice %8 {offsets = [0, 32], sizes = [1, 32], strides = [1, 1]} : vector<1x64xf32> to vector<1x32xf32>
    %44 = vector.broadcast %43 : vector<1x32xf32> to vector<128x32xf32>
    %45 = arith.mulf %42, %44 : vector<128x32xf32>
    %46 = vector.extract_strided_slice %9 {offsets = [0, 32], sizes = [1, 32], strides = [1, 1]} : vector<1x64xf32> to vector<1x32xf32>
    %47 = vector.broadcast %46 : vector<1x32xf32> to vector<128x32xf32>
    %48 = arith.addf %45, %47 : vector<128x32xf32>
    %cst_19 = arith.constant 0.000000e+00 : f32
    %49 = vector.broadcast %cst_19 : f32 to vector<128x32xf32>
    %50 = arith.maximumf %40, %49 : vector<128x32xf32>
    %cst_20 = arith.constant 0.000000e+00 : f32
    %51 = vector.broadcast %cst_20 : f32 to vector<128x32xf32>
    %52 = arith.maximumf %48, %51 : vector<128x32xf32>
    %c0_21 = arith.constant 0 : index
    %c0_22 = arith.constant 0 : index
    %53 = vector.load %arg9[%c0_21, %c0_22] : memref<1x32xf32, #tpu.memory_space<vmem>>, vector<1x32xf32>
    %c0_23 = arith.constant 0 : index
    %c0_24 = arith.constant 0 : index
    %54 = vector.load %arg8[%c0_23, %c0_24] : memref<64x32xf32, #tpu.memory_space<vmem>>, vector<32x32xf32>
    %cst_25 = arith.constant dense<0.000000e+00> : vector<128x32xf32>
    %55 = tpu.matmul %50, %54, %cst_25 {dimension_numbers = #tpu.dot_dimension_numbers<[1], [0], [0], [1], [0, 0, 1, 1], [], []>} : vector<128x32xf32>, vector<32x32xf32>, vector<128x32xf32> -> vector<128x32xf32>
    %56 = vector.broadcast %53 : vector<1x32xf32> to vector<128x32xf32>
    %57 = arith.addf %56, %55 : vector<128x32xf32>
    %c32 = arith.constant 32 : index
    %c0_26 = arith.constant 0 : index
    %58 = vector.load %arg8[%c32, %c0_26] : memref<64x32xf32, #tpu.memory_space<vmem>>, vector<32x32xf32>
    %cst_27 = arith.constant dense<0.000000e+00> : vector<128x32xf32>
    %59 = tpu.matmul %52, %58, %cst_27 {dimension_numbers = #tpu.dot_dimension_numbers<[1], [0], [0], [1], [0, 0, 1, 1], [], []>} : vector<128x32xf32>, vector<32x32xf32>, vector<128x32xf32> -> vector<128x32xf32>
    %60 = arith.addf %57, %59 : vector<128x32xf32>
    %c0_28 = arith.constant 0 : index
    %c0_29 = arith.constant 0 : index
    %61 = vector.load %arg3[%c0_28, %c0_29] : memref<128x128xf32, #tpu.memory_space<vmem>>, vector<128x128xf32>
    %cst_30 = arith.constant dense<0.000000e+00> : vector<128x32xf32>
    %62 = tpu.matmul %61, %60, %cst_30 {dimension_numbers = #tpu.dot_dimension_numbers<[1], [0], [0], [1], [0, 0, 1, 1], [], []>} : vector<128x128xf32>, vector<128x32xf32>, vector<128x32xf32> -> vector<128x32xf32>
    %cst_31 = arith.constant 0.000000e+00 : f32
    %63 = vector.broadcast %cst_31 : f32 to vector<128x32xf32>
    %64 = arith.maximumf %62, %63 : vector<128x32xf32>
    %c0_32 = arith.constant 0 : index
    %c0_33 = arith.constant 0 : index
    %65 = vector.load %arg11[%c0_32, %c0_33] : memref<1x32xf32, #tpu.memory_space<vmem>>, vector<1x32xf32>
    %c0_34 = arith.constant 0 : index
    %c0_35 = arith.constant 0 : index
    %66 = vector.load %arg10[%c0_34, %c0_35] : memref<32x32xf32, #tpu.memory_space<vmem>>, vector<32x32xf32>
    %cst_36 = arith.constant dense<0.000000e+00> : vector<128x32xf32>
    %67 = tpu.matmul %64, %66, %cst_36 {dimension_numbers = #tpu.dot_dimension_numbers<[1], [0], [0], [1], [0, 0, 1, 1], [], []>} : vector<128x32xf32>, vector<32x32xf32>, vector<128x32xf32> -> vector<128x32xf32>
    %68 = vector.broadcast %65 : vector<1x32xf32> to vector<128x32xf32>
    %69 = arith.addf %68, %67 : vector<128x32xf32>
    %cst_37 = arith.constant 0.000000e+00 : f32
    %70 = vector.broadcast %cst_37 : f32 to vector<128x32xf32>
    %71 = arith.maximumf %69, %70 : vector<128x32xf32>
    %c0_38 = arith.constant 0 : index
    %c0_39 = arith.constant 0 : index
    %72 = vector.load %arg13[%c0_38, %c0_39] : memref<1x128xf32, #tpu.memory_space<vmem>>, vector<1x128xf32>
    %c0_40 = arith.constant 0 : index
    %c0_41 = arith.constant 0 : index
    %73 = vector.load %arg12[%c0_40, %c0_41] : memref<32x128xf32, #tpu.memory_space<vmem>>, vector<32x128xf32>
    %cst_42 = arith.constant dense<0.000000e+00> : vector<128x128xf32>
    %74 = tpu.matmul %71, %73, %cst_42 {dimension_numbers = #tpu.dot_dimension_numbers<[1], [0], [0], [1], [0, 0, 1, 1], [], []>} : vector<128x32xf32>, vector<32x128xf32>, vector<128x128xf32> -> vector<128x128xf32>
    %75 = vector.broadcast %72 : vector<1x128xf32> to vector<128x128xf32>
    %76 = arith.addf %75, %74 : vector<128x128xf32>
    %c0_43 = arith.constant 0 : index
    %c0_44 = arith.constant 0 : index
    %77 = vector.load %arg14[%c0_43, %c0_44] : memref<128x128xf32, #tpu.memory_space<vmem>>, vector<128x128xf32>
    tpu.vector_store %arg14[%c0_43, %c0_44], %76 {strides = array<i32>} : memref<128x128xf32, #tpu.memory_space<vmem>>, vector<128x128xf32>,
    return
  }
  func.func @transform_0(%arg0: i32) -> (i32, i32) {
    %c0_i32 = arith.constant 0 : i32
    %c0_i32_0 = arith.constant 0 : i32
    %c0_i32_1 = arith.constant 0 : i32
    return %c0_i32, %c0_i32_0 : i32, i32
  }
  func.func @transform_1(%arg0: i32) -> (i32, i32) {
    %c0_i32 = arith.constant 0 : i32
    %c0_i32_0 = arith.constant 0 : i32
    %c0_i32_1 = arith.constant 0 : i32
    return %c0_i32, %c0_i32_0 : i32, i32
  }
  func.func @transform_2(%arg0: i32) -> (i32, i32) {
    %c0_i32 = arith.constant 0 : i32
    %c0_i32_0 = arith.constant 0 : i32
    %c0_i32_1 = arith.constant 0 : i32
    return %c0_i32, %c0_i32_0 : i32, i32
  }
  func.func @transform_3(%arg0: i32) -> (i32, i32) {
    %c0_i32 = arith.constant 0 : i32
    %c0_i32_0 = arith.constant 0 : i32
    %c0_i32_1 = arith.constant 0 : i32
    return %c0_i32, %c0_i32_0 : i32, i32
  }
  func.func @transform_4(%arg0: i32) -> (i32, i32) {
    %c0_i32 = arith.constant 0 : i32
    %c0_i32_0 = arith.constant 0 : i32
    %c0_i32_1 = arith.constant 0 : i32
    return %c0_i32, %c0_i32_0 : i32, i32
  }
  func.func @transform_5(%arg0: i32) -> (i32, i32) {
    %c0_i32 = arith.constant 0 : i32
    %c0_i32_0 = arith.constant 0 : i32
    %c0_i32_1 = arith.constant 0 : i32
    return %c0_i32, %c0_i32_0 : i32, i32
  }
  func.func @transform_6(%arg0: i32) -> (i32, i32) {
    %c0_i32 = arith.constant 0 : i32
    %c0_i32_0 = arith.constant 0 : i32
    %c0_i32_1 = arith.constant 0 : i32
    return %c0_i32, %c0_i32_0 : i32, i32
  }
  func.func @transform_7(%arg0: i32) -> (i32, i32) {
    %c0_i32 = arith.constant 0 : i32
    %c0_i32_0 = arith.constant 0 : i32
    %c0_i32_1 = arith.constant 0 : i32
    return %c0_i32, %c0_i32_0 : i32, i32
  }
  func.func @transform_8(%arg0: i32) -> (i32, i32) {
    %c0_i32 = arith.constant 0 : i32
    %c0_i32_0 = arith.constant 0 : i32
    %c0_i32_1 = arith.constant 0 : i32
    return %c0_i32, %c0_i32_0 : i32, i32
  }
  func.func @transform_9(%arg0: i32) -> (i32, i32) {
    %c0_i32 = arith.constant 0 : i32
    %c0_i32_0 = arith.constant 0 : i32
    %c0_i32_1 = arith.constant 0 : i32
    return %c0_i32, %c0_i32_0 : i32, i32
  }
  func.func @transform_10(%arg0: i32) -> (i32, i32) {
    %c0_i32 = arith.constant 0 : i32
    %c0_i32_0 = arith.constant 0 : i32
    %c0_i32_1 = arith.constant 0 : i32
    return %c0_i32, %c0_i32_0 : i32, i32
  }
  func.func @transform_11(%arg0: i32) -> (i32, i32) {
    %c0_i32 = arith.constant 0 : i32
    %c0_i32_0 = arith.constant 0 : i32
    %c0_i32_1 = arith.constant 0 : i32
    return %c0_i32, %c0_i32_0 : i32, i32
  }
  func.func @transform_12(%arg0: i32) -> (i32, i32) {
    %c0_i32 = arith.constant 0 : i32
    %c0_i32_0 = arith.constant 0 : i32
    %c0_i32_1 = arith.constant 0 : i32
    return %c0_i32, %c0_i32_0 : i32, i32
  }
  func.func @transform_13(%arg0: i32) -> (i32, i32) {
    %c0_i32 = arith.constant 0 : i32
    %c0_i32_0 = arith.constant 0 : i32
    %c0_i32_1 = arith.constant 0 : i32
    return %c0_i32, %c0_i32_0 : i32, i32
  }
}

</mosaic_0001>

<bundles_post_ra>
// kernel: tpu_custom_call.1
= control target key start
LH: loop header
LB: loop body
LE: loop exit
PB: predicated region body
PF: predicated region fallthrough
CT: control target
= control target key end

     0   :  { %vm70_vm0 = vcmask 523264   ;;  %s3719_s0 = inlined_call_operand.vmem [shape: f32[128,64], index: 0, kind: input, shape index: {}]   ;;  %s3720_s1 = inlined_call_operand.vmem [shape: f32[128,128], index: 1, kind: input, shape index: {}]   ;;  %s3721_s2 = inlined_call_operand.vmem [shape: f32[128,128], index: 2, kind: input, shape index: {}]   ;;  %s3722_s3 = inlined_call_operand.vmem [shape: f32[64,32], index: 3, kind: input, shape index: {}]   ;;  %s3723_s4 = inlined_call_operand.vmem [shape: f32[1,32], index: 4, kind: input, shape index: {}]   ;;  %s3724_s5 = inlined_call_operand.vmem [shape: f32[1,64], index: 5, kind: input, shape index: {}]   ;;  %s3725_s6 = inlined_call_operand.vmem [shape: f32[1,64], index: 6, kind: input, shape index: {}]   ;;  %s3726_s7 = inlined_call_operand.vmem [shape: f32[64,32], index: 7, kind: input, shape index: {}]   ;;  %s3727_s8 = inlined_call_operand.vmem [shape: f32[1,32], index: 8, kind: input, shape index: {}]   ;;  %s3728_s9 = inlined_call_operand.vmem [shape: f32[32,32], index: 9, kind: input, shape index: {}]   ;;  %s3729_s10 = inlined_call_operand.vmem [shape: f32[1,32], index: 10, kind: input, shape index: {}]   ;;  %s3730_s11 = inlined_call_operand.vmem [shape: f32[32,128], index: 11, kind: input, shape index: {}]   ;;  %s3731_s12 = inlined_call_operand.vmem [shape: f32[1,128], index: 12, kind: input, shape index: {}]   ;;  %s3732_s13 = inlined_call_operand.hbm [shape: f32[128,128], index: 13, kind: output, shape index: {}]  }
   0x1   :  { %v62_v0 = vld [vmem:[%s3722_s3] sm:$0xff]  ;;  %v63_v1 = vld [vmem:[%s3722_s3 + $0x8] sm:$0xff]  ;;  %v64_v2 = vld [vmem:[%s3722_s3 + $0x10] sm:$0xff] }
   0x2   :  { %v2580_v3 = vpack.c.bf16 %v63_v1, %v62_v0  ;;  %v65_v4 = vld [vmem:[%s3722_s3 + $0x18] sm:$0xff]  ;;  %v66_v6 = vld [vmem:[%s3722_s3 + $0x20] sm:$0xff]  ;;  %v67_v7 = vld [vmem:[%s3722_s3 + $0x28] sm:$0xff] }
   0x3   :  { %v2584_v5 = vpack.c.bf16 %v65_v4, %v64_v2  ;;  %v45_v8 = vld [vmem:[%s3719_s0] sm:$0xff]  ;;  %v2588_v9 = vpack.c.bf16 %v67_v7, %v66_v6  ;;  %v68_v10 = vld [vmem:[%s3722_s3 + $0x30] sm:$0xff]  ;;  %v69_v11 = vld [vmem:[%s3722_s3 + $0x38] sm:$0xff] }
   0x4   :  { %2581 = vmatprep.subr.bf16.mxu0 %v2580_v3  ;;  %2316 = vmatprep.mubr.msk.f32.mxu0 %vm70_vm0, %v45_v8 }
   0x5   :  { %2583 = vmatpush3.bf16.msra.mxu0 %v2580_v3 }
   0x6   :  { %2585 = vmatprep.subr.bf16.mxu0 %v2584_v5 }
   0x9   :  { %2587 = vmatpush3.bf16.msra.mxu0 %v2584_v5 }
   0xa   :  { %18 = vsyncpa [#allocation3], 0  ;;  %2589 = vmatprep.subr.bf16.mxu0 %v2588_v9  ;;  %v2592_v12 = vpack.c.bf16 %v69_v11, %v68_v10  ;;  %v46_v13 = vld [vmem:[%s3719_s0 + $0x8] sm:$0xff]  ;;  %v47_v14 = vld [vmem:[%s3719_s0 + $0x10] sm:$0xff]  ;;  %vm449_vm1 = vcmask 261120   ;;  %s2788_s25 = smov 96  }
   0xb   :  { %v48_v15 = vld [vmem:[%s3719_s0 + $0x18] sm:$0xff]  ;;  %v49_v16 = vld [vmem:[%s3719_s0 + $0x20] sm:$0xff]  ;;  %v50_v17 = vld [vmem:[%s3719_s0 + $0x28] sm:$0xff] }
   0xc   :  { %v51_v18 = vld [vmem:[%s3719_s0 + $0x30] sm:$0xff]  ;;  %v52_v19 = vld [vmem:[%s3719_s0 + $0x38] sm:$0xff]  ;;  %v53_v20 = vld [vmem:[%s3719_s0 + $0x40] sm:$0xff] }
   0xd   :  { %2591 = vmatpush3.bf16.msra.mxu0 %v2588_v9  ;;  %v54_v21 = vld [vmem:[%s3719_s0 + $0x48] sm:$0xff]  ;;  %v55_v22 = vld [vmem:[%s3719_s0 + $0x50] sm:$0xff]  ;;  %v56_v23 = vld [vmem:[%s3719_s0 + $0x58] sm:$0xff] }
   0xe   :  { %2593 = vmatprep.subr.bf16.mxu0 %v2592_v12  ;;  %v57_v24 = vld [vmem:[%s3719_s0 + $0x60] sm:$0xff]  ;;  %v58_v25 = vld [vmem:[%s3719_s0 + $0x68] sm:$0xff]  ;;  %v59_v26 = vld [vmem:[%s3719_s0 + $0x70] sm:$0xff] }
   0xf   :  { %v60_v27 = vld [vmem:[%s3719_s0 + $0x78] sm:$0xff]  ;;  %v286_v28 = vld [vmem:[%s3720_s1] sm:$0xff] }
  0x10   :  { %2372 = vmatprep.mubr.f32.mxu1 %v286_v28  ;;  %v2956_v29 = vld [vmem:[%s3723_s4] ss:$0 sm:$0xff]  ;;  %v301_v28 = vld [vmem:[%s3720_s1 + $0x78] sm:$0xff] }
  0x11   :  { %2595 = vmatpush3.bf16.msra.mxu0 %v2592_v12 }
  0x14   :  { %2317 = vmatmul.mubr.msk.f32.vlgmr.msra.gmra.mrb[0].mxu0 %vm70_vm0, %v46_v13 }
  0x15   :  { %2319 = vmatprep.mubr.msk.f32.mxu0 %vm70_vm0, %v47_v14  ;;  %v287_v14 = vld [vmem:[%s3720_s1 + $0x8] sm:$0xff] }
  0x18   :  { %2320 = vmatmul.mubr.msk.f32.gmra.mrb[2].mxu0 %vm70_vm0, %v48_v15  ;;  %v288_v15 = vld [vmem:[%s3720_s1 + $0x10] sm:$0xff] }
  0x19   :  { %2322 = vmatprep.mubr.msk.f32.mxu0 %vm70_vm0, %v49_v16  ;;  %v289_v16 = vld [vmem:[%s3720_s1 + $0x18] sm:$0xff] }
  0x1c   :  { %2323 = vmatmul.mubr.msk.f32.gmra.mrb[4].mxu0 %vm70_vm0, %v50_v17  ;;  %v290_v17 = vld [vmem:[%s3720_s1 + $0x20] sm:$0xff] }
  0x1d   :  { %2325 = vmatprep.mubr.msk.f32.mxu0 %vm70_vm0, %v51_v18  ;;  %v291_v18 = vld [vmem:[%s3720_s1 + $0x28] sm:$0xff] }
  0x20   :  { %2326 = vmatmul.mubr.msk.f32.gmra.mrb[6].mxu0 %vm70_vm0, %v52_v19  ;;  %v292_v19 = vld [vmem:[%s3720_s1 + $0x30] sm:$0xff] }
  0x21   :  { %2328 = vmatprep.mubr.msk.f32.mxu0 %vm70_vm0, %v53_v20  ;;  %v293_v20 = vld [vmem:[%s3720_s1 + $0x38] sm:$0xff] }
  0x24   :  { %2329 = vmatmul.mubr.msk.f32.gmra.mrb[8].mxu0 %vm70_vm0, %v54_v21  ;;  %v294_v21 = vld [vmem:[%s3720_s1 + $0x40] sm:$0xff] }
  0x25   :  { %2331 = vmatprep.mubr.msk.f32.mxu0 %vm70_vm0, %v55_v22  ;;  %v295_v22 = vld [vmem:[%s3720_s1 + $0x48] sm:$0xff] }
  0x28   :  { %2332 = vmatmul.mubr.msk.f32.gmra.mrb[10].mxu0 %vm70_vm0, %v56_v23  ;;  %v296_v23 = vld [vmem:[%s3720_s1 + $0x50] sm:$0xff] }
  0x29   :  { %2334 = vmatprep.mubr.msk.f32.mxu0 %vm70_vm0, %v57_v24  ;;  %v297_v24 = vld [vmem:[%s3720_s1 + $0x58] sm:$0xff] }
  0x2c   :  { %2335 = vmatmul.mubr.msk.f32.gmra.mrb[12].mxu0 %vm70_vm0, %v58_v25  ;;  %v298_v25 = vld [vmem:[%s3720_s1 + $0x60] sm:$0xff] }
  0x2d   :  { %2337 = vmatprep.mubr.msk.f32.mxu0 %vm70_vm0, %v59_v26  ;;  %v299_v26 = vld [vmem:[%s3720_s1 + $0x68] sm:$0xff] }
  0x30   :  { %2338 = vmatmul.mubr.msk.f32.gmra.mrb[14].mxu0 %vm70_vm0, %v60_v27  ;;  %v300_v27 = vld [vmem:[%s3720_s1 + $0x70] sm:$0xff] }
  0xe7   :  { %v2318_v30 = vpop.f32.mrb[0].mxu0 }
  0xe8   :  { %v2959_v31 = vadd.f32 %v2318_v30, %v2956_v29  ;;  %v185_v32 = vpop.f32.mrb[1].mxu0 }
  0xe9   :  { %v2962_v33 = vadd.f32 %v2956_v29, %v185_v32 }
  0xea   :  { %v453_v34 = vsel %vm449_vm1, %v2959_v31, 0.0 }
  0xeb   :  { %454 = vadd.xlane.f32.xlu1 %v453_v34  ;;  %v2321_v35 = vpop.f32.mrb[2].mxu0  ;;  %v450_v36 = vsel %vm449_vm1, %v2962_v33, 0.0  ;;  %v2596_v37 = vpack.c.bf16 %v2959_v31, %v2962_v33 }
  0xec   :  { %v2971_v38 = vadd.f32 %v2321_v35, %v2956_v29  ;;  %451 = vadd.xlane.f32.xlu0 %v450_v36  ;;  %v195_v39 = vpop.f32.mrb[3].mxu0 }
  0xed   :  { %v2974_v40 = vadd.f32 %v2956_v29, %v195_v39  ;;  %2597 = vmatprep.subr.bf16.mxu1 %v2596_v37 }
  0xee   :  { %2599 = vmatpush3.bf16.msra.mxu1 %v2596_v37  ;;  %v459_v41 = vsel %vm449_vm1, %v2971_v38, 0.0 }
  0xef   :  { %v2324_v42 = vpop.f32.mrb[4].mxu0  ;;  %v2600_v43 = vpack.c.bf16 %v2971_v38, %v2974_v40  ;;  %v456_v48 = vsel %vm449_vm1, %v2974_v40, 0.0 }
  0xf0   :  { %v2981_v44 = vadd.f32 %v2324_v42, %v2956_v29  ;;  %460 = vadd.xlane.f32.xlu0 %v459_v41  ;;  %v205_v45 = vpop.f32.mrb[5].mxu0 }
  0xf1   :  { %v2984_v46 = vadd.f32 %v2956_v29, %v205_v45  ;;  %2601 = vmatprep.subr.bf16.mxu1 %v2600_v43 }
  0xf2   :  { %2603 = vmatpush3.bf16.msra.mxu1 %v2600_v43  ;;  %v465_v54 = vsel %vm449_vm1, %v2981_v44, 0.0 }
  0xf3   :  { %v2327_v47 = vpop.f32.mrb[6].mxu0  ;;  %v2604_v49 = vpack.c.bf16 %v2981_v44, %v2984_v46  ;;  %v462_v60 = vsel %vm449_vm1, %v2984_v46, 0.0 }
  0xf4   :  { %v2991_v50 = vadd.f32 %v2327_v47, %v2956_v29  ;;  %457 = vadd.xlane.f32.xlu0 %v456_v48  ;;  %v215_v51 = vpop.f32.mrb[7].mxu0 }
  0xf5   :  { %v2994_v52 = vadd.f32 %v2956_v29, %v215_v51  ;;  %2605 = vmatprep.subr.bf16.mxu1 %v2604_v49 }
  0xf6   :  { %2607 = vmatpush3.bf16.msra.mxu1 %v2604_v49  ;;  %v471_v2 = vsel %vm449_vm1, %v2991_v50, 0.0 }
  0xf7   :  { %v2330_v53 = vpop.f32.mrb[8].mxu0  ;;  %v2608_v55 = vpack.c.bf16 %v2991_v50, %v2994_v52  ;;  %v468_v8 = vsel %vm449_vm1, %v2994_v52, 0.0 }
  0xf8   :  { %v3001_v56 = vadd.f32 %v2330_v53, %v2956_v29  ;;  %466 = vadd.xlane.f32.xlu0 %v465_v54  ;;  %v225_v57 = vpop.f32.mrb[9].mxu0 }
  0xf9   :  { %v3004_v58 = vadd.f32 %v2956_v29, %v225_v57  ;;  %2609 = vmatprep.subr.bf16.mxu1 %v2608_v55 }
  0xfa   :  { %2611 = vmatpush3.bf16.msra.mxu1 %v2608_v55  ;;  %v477_v45 = vsel %vm449_vm1, %v3001_v56, 0.0 }
  0xfb   :  { %v2333_v59 = vpop.f32.mrb[10].mxu0  ;;  %v2612_v61 = vpack.c.bf16 %v3001_v56, %v3004_v58  ;;  %v474_v39 = vsel %vm449_vm1, %v3004_v58, 0.0 }
  0xfc   :  { %v3011_v62 = vadd.f32 %v2333_v59, %v2956_v29  ;;  %463 = vadd.xlane.f32.xlu0 %v462_v60  ;;  %v235_v63 = vpop.f32.mrb[11].mxu0 }
  0xfd   :  { %v3014_v0 = vadd.f32 %v2956_v29, %v235_v63  ;;  %2613 = vmatprep.subr.bf16.mxu1 %v2612_v61 }
  0xfe   :  { %2615 = vmatpush3.bf16.msra.mxu1 %v2612_v61  ;;  %v483_v57 = vsel %vm449_vm1, %v3011_v62, 0.0 }
  0xff   :  { %v2336_v1 = vpop.f32.mrb[12].mxu0  ;;  %v2616_v3 = vpack.c.bf16 %v3011_v62, %v3014_v0  ;;  %v480_v51 = vsel %vm449_vm1, %v3014_v0, 0.0 }
 0x100   :  { %v3021_v4 = vadd.f32 %v2336_v1, %v2956_v29  ;;  %472 = vadd.xlane.f32.xlu0 %v471_v2  ;;  %v245_v5 = vpop.f32.mrb[13].mxu0 }
 0x101   :  { %v3024_v6 = vadd.f32 %v2956_v29, %v245_v5  ;;  %2617 = vmatprep.subr.bf16.mxu1 %v2616_v3 }
 0x102   :  { %2619 = vmatpush3.bf16.msra.mxu1 %v2616_v3  ;;  %v489_v5 = vsel %vm449_vm1, %v3021_v4, 0.0 }
 0x103   :  { %v2339_v7 = vpop.f32.mrb[14].mxu0  ;;  %v2620_v9 = vpack.c.bf16 %v3021_v4, %v3024_v6  ;;  %v486_v63 = vsel %vm449_vm1, %v3024_v6, 0.0 }
 0x104   :  { %v3031_v10 = vadd.f32 %v2339_v7, %v2956_v29  ;;  %469 = vadd.xlane.f32.xlu0 %v468_v8  ;;  %v255_v11 = vpop.f32.mrb[15].mxu0 }
 0x105   :  { %v3034_v12 = vadd.f32 %v2956_v29, %v255_v11  ;;  %2621 = vmatprep.subr.bf16.mxu1 %v2620_v9 }
 0x106   :  { %2623 = vmatpush3.bf16.msra.mxu1 %v2620_v9 }
 0x107   :  { %v2624_v13 = vpack.c.bf16 %v3031_v10, %v3034_v12  ;;  %v492_v11 = vsel %vm449_vm1, %v3034_v12, 0.0 }
 0x109   :  { %2625 = vmatprep.subr.bf16.mxu1 %v2624_v13 }
 0x10a   :  { %2627 = vmatpush3.bf16.msra.mxu1 %v2624_v13 }
 0x10d   :  { %2373 = vmatmul.mubr.f32.vlgmr.msra.gmra.mrb[0].mxu1 %v287_v14  ;;  %v495_v14 = vsel %vm449_vm1, %v3031_v10, 0.0 }
 0x10e   :  { %2375 = vmatprep.mubr.f32.mxu1 %v288_v15 }
 0x111   :  { %2376 = vmatmul.mubr.f32.gmra.mrb[2].mxu1 %v289_v16 }
 0x112   :  { %2378 = vmatprep.mubr.f32.mxu1 %v290_v17 }
 0x115   :  { %2379 = vmatmul.mubr.f32.gmra.mrb[4].mxu1 %v291_v18 }
 0x116   :  { %2381 = vmatprep.mubr.f32.mxu1 %v292_v19 }
 0x119   :  { %2382 = vmatmul.mubr.f32.gmra.mrb[6].mxu1 %v293_v20 }
 0x11a   :  { %2384 = vmatprep.mubr.f32.mxu1 %v294_v21 }
 0x11d   :  { %2385 = vmatmul.mubr.f32.gmra.mrb[8].mxu1 %v295_v22 }
 0x11e   :  { %2387 = vmatprep.mubr.f32.mxu1 %v296_v23 }
 0x121   :  { %2388 = vmatmul.mubr.f32.gmra.mrb[10].mxu1 %v297_v24 }
 0x122   :  { %2390 = vmatprep.mubr.f32.mxu1 %v298_v25 }
 0x125   :  { %2391 = vmatmul.mubr.f32.gmra.mrb[12].mxu1 %v299_v26 }
 0x126   :  { %2393 = vmatprep.mubr.f32.mxu1 %v300_v27 }
 0x129   :  { %2394 = vmatmul.mubr.f32.gmra.mrb[14].mxu1 %v301_v28 }
 0x178   :  { %v455_v27 = vpop.xlane.xlu1 %454 }
 0x179   :  { %v452_v21 = vpop.xlane.xlu0 %451 }
 0x17d   :  { %v461_v22 = vpop.xlane.xlu0 %460 }
 0x181   :  { %v458_v23 = vpop.xlane.xlu0 %457 }
 0x185   :  { %v467_v24 = vpop.xlane.xlu0 %466 }
 0x189   :  { %v464_v25 = vpop.xlane.xlu0 %463 }
 0x18d   :  { %v473_v26 = vpop.xlane.xlu0 %472 }
 0x191   :  { %v3163_v28 = vpop.xlane.xlu0 %469 }
 0x1e0   :  { %v3083_v29 = vpop.f32.mrb[0].mxu1 }
 0x1e1   :  { %v3085_v30 = vpop.f32.mrb[1].mxu1  ;;  %v501_v32 = vsel %vm449_vm1, %v3083_v29, 0.0 }
 0x1e2   :  { %502 = vadd.xlane.f32.xlu1 %v501_v32  ;;  %v498_v34 = vsel %vm449_vm1, %v3085_v30, 0.0 }
 0x1e3   :  { %499 = vadd.xlane.f32.xlu0 %v498_v34 }
 0x1e4   :  { %v3091_v35 = vpop.f32.mrb[2].mxu1 }
 0x1e5   :  { %v507_v36 = vsel %vm449_vm1, %v3091_v35, 0.0  ;;  %v3095_v37 = vpop.f32.mrb[3].mxu1 }
 0x1e6   :  { %508 = vadd.xlane.f32.xlu1 %v507_v36  ;;  %v504_v41 = vsel %vm449_vm1, %v3095_v37, 0.0 }
 0x1e7   :  { %475 = vadd.xlane.f32.xlu0 %v474_v39 }
 0x1e8   :  { %v3101_v42 = vpop.f32.mrb[4].mxu1 }
 0x1e9   :  { %v3103_v43 = vpop.f32.mrb[5].mxu1  ;;  %v513_v47 = vsel %vm449_vm1, %v3101_v42, 0.0 }
 0x1ea   :  { %505 = vadd.xlane.f32.xlu1 %v504_v41  ;;  %v510_v53 = vsel %vm449_vm1, %v3103_v43, 0.0 }
 0x1eb   :  { %478 = vadd.xlane.f32.xlu0 %v477_v45 }
 0x1ec   :  { %v3109_v48 = vpop.f32.mrb[6].mxu1 }
 0x1ed   :  { %v3111_v49 = vpop.f32.mrb[7].mxu1  ;;  %v519_v59 = vsel %vm449_vm1, %v3109_v48, 0.0 }
 0x1ee   :  { %514 = vadd.xlane.f32.xlu1 %v513_v47  ;;  %v516_v1 = vsel %vm449_vm1, %v3111_v49, 0.0 }
 0x1ef   :  { %481 = vadd.xlane.f32.xlu0 %v480_v51 }
 0x1f0   :  { %v3117_v54 = vpop.f32.mrb[8].mxu1 }
 0x1f1   :  { %v3119_v55 = vpop.f32.mrb[9].mxu1  ;;  %v525_v7 = vsel %vm449_vm1, %v3117_v54, 0.0 }
 0x1f2   :  { %511 = vadd.xlane.f32.xlu1 %v510_v53  ;;  %v522_v13 = vsel %vm449_vm1, %v3119_v55, 0.0 }
 0x1f3   :  { %484 = vadd.xlane.f32.xlu0 %v483_v57 }
 0x1f4   :  { %v3125_v60 = vpop.f32.mrb[10].mxu1 }
 0x1f5   :  { %v3127_v61 = vpop.f32.mrb[11].mxu1  ;;  %v531_v15 = vsel %vm449_vm1, %v3125_v60, 0.0 }
 0x1f6   :  { %520 = vadd.xlane.f32.xlu1 %v519_v59  ;;  %v528_v16 = vsel %vm449_vm1, %v3127_v61, 0.0 }
 0x1f7   :  { %487 = vadd.xlane.f32.xlu0 %v486_v63 }
 0x1f8   :  { %v3133_v2 = vpop.f32.mrb[12].mxu1 }
 0x1f9   :  { %v3135_v3 = vpop.f32.mrb[13].mxu1  ;;  %v537_v17 = vsel %vm449_vm1, %v3133_v2, 0.0 }
 0x1fa   :  { %517 = vadd.xlane.f32.xlu1 %v516_v1  ;;  %v534_v18 = vsel %vm449_vm1, %v3135_v3, 0.0 }
 0x1fb   :  { %490 = vadd.xlane.f32.xlu0 %v489_v5 }
 0x1fc   :  { %v3141_v8 = vpop.f32.mrb[14].mxu1 }
 0x1fd   :  { %v3143_v9 = vpop.f32.mrb[15].mxu1  ;;  %v543_v20 = vsel %vm449_vm1, %v3141_v8, 0.0 }
 0x1fe   :  { %526 = vadd.xlane.f32.xlu1 %v525_v7  ;;  %v540_v19 = vsel %vm449_vm1, %v3143_v9, 0.0 }
 0x1ff   :  { %493 = vadd.xlane.f32.xlu0 %v492_v11 }
 0x202   :  { %523 = vadd.xlane.f32.xlu1 %v522_v13 }
 0x203   :  { %496 = vadd.xlane.f32.xlu0 %v495_v14 }
 0x206   :  { %532 = vadd.xlane.f32.xlu1 %v531_v15 }
 0x20a   :  { %529 = vadd.xlane.f32.xlu1 %v528_v16 }
 0x20e   :  { %538 = vadd.xlane.f32.xlu1 %v537_v17 }
 0x212   :  { %535 = vadd.xlane.f32.xlu1 %v534_v18 }
 0x216   :  { %541 = vadd.xlane.f32.xlu1 %v540_v19 }
 0x21a   :  { %544 = vadd.xlane.f32.xlu1 %v543_v20 }
 0x26f   :  { %v503_v32 = vpop.xlane.xlu1 %502 }
 0x270   :  { %v547_v34 = vadd.f32 %v503_v32, %v455_v27  ;;  %v500_v36 = vpop.xlane.xlu0 %499 }
 0x271   :  { %v546_v39 = vadd.f32 %v500_v36, %v452_v21 }
 0x272   :  { %v563_v41 = vmul.f32 0.015625, %v547_v34 }
 0x273   :  { %v562_v45 = vmul.f32 0.015625, %v546_v39  ;;  %v509_v47 = vpop.xlane.xlu1 %508 }
 0x274   :  { %v3166_v51 = vsub.f32 %v2959_v31, %v563_v41  ;;  %v3169_v53 = vsub.f32 %v3083_v29, %v563_v41  ;;  %v549_v57 = vadd.f32 %v509_v47, %v461_v22 }
 0x275   :  { %v3172_v59 = vsub.f32 %v2962_v33, %v562_v45  ;;  %v3175_v63 = vsub.f32 %v3085_v30, %v562_v45 }
 0x276   :  { %v565_v1 = vmul.f32 0.015625, %v549_v57  ;;  %v611_v5 = vmul.f32 %v3166_v51, %v3166_v51  ;;  %v675_v7 = vmul.f32 %v3169_v53, %v3169_v53 }
 0x277   :  { %v506_v11 = vpop.xlane.xlu1 %505  ;;  %v610_v33 = vmul.f32 %v3172_v59, %v3172_v59  ;;  %v674_v15 = vmul.f32 %v3175_v63, %v3175_v63 }
 0x278   :  { %v3182_v31 = vsub.f32 %v2971_v38, %v565_v1  ;;  %v548_v29 = vadd.f32 %v506_v11, %v458_v23  ;;  %v629_v13 = vsel %vm449_vm1, %v611_v5, 0.0  ;;  %v3188_v30 = vsub.f32 %v3091_v35, %v565_v1  ;;  %v476_v35 = vpop.xlane.xlu0 %475 }
 0x279   :  { %630 = vadd.xlane.f32.xlu0 %v629_v13  ;;  %v693_v14 = vsel %vm449_vm1, %v675_v7, 0.0  ;;  %v626_v19 = vsel %vm449_vm1, %v610_v33, 0.0  ;;  %v690_v22 = vsel %vm449_vm1, %v674_v15, 0.0 }
 0x27a   :  { %v564_v16 = vmul.f32 0.015625, %v548_v29  ;;  %694 = vadd.xlane.f32.xlu1 %v693_v14  ;;  %v613_v20 = vmul.f32 %v3182_v31, %v3182_v31  ;;  %v677_v23 = vmul.f32 %v3188_v30, %v3188_v30 }
 0x27b   :  { %v515_v17 = vpop.xlane.xlu1 %514 }
 0x27c   :  { %v3194_v38 = vsub.f32 %v2974_v40, %v564_v16  ;;  %v551_v18 = vadd.f32 %v515_v17, %v467_v24  ;;  %v3200_v21 = vsub.f32 %v3095_v37, %v564_v16  ;;  %v635_v34 = vsel %vm449_vm1, %v613_v20, 0.0  ;;  %v479_v47 = vpop.xlane.xlu0 %478 }
 0x27d   :  { %627 = vadd.xlane.f32.xlu0 %v626_v19  ;;  %v699_v39 = vsel %vm449_vm1, %v677_v23, 0.0 }
 0x27e   :  { %v567_v27 = vmul.f32 0.015625, %v551_v18  ;;  %691 = vadd.xlane.f32.xlu1 %v690_v22  ;;  %v612_v36 = vmul.f32 %v3194_v38, %v3194_v38  ;;  %v676_v41 = vmul.f32 %v3200_v21, %v3200_v21 }
 0x27f   :  { %v512_v40 = vpop.xlane.xlu1 %511 }
 0x280   :  { %v3206_v24 = vsub.f32 %v2981_v44, %v567_v27  ;;  %v550_v32 = vadd.f32 %v512_v40, %v464_v25  ;;  %v3212_v37 = vsub.f32 %v3101_v42, %v567_v27  ;;  %v632_v1 = vsel %vm449_vm1, %v612_v36, 0.0  ;;  %v482_v14 = vpop.xlane.xlu0 %481 }
 0x281   :  { %636 = vadd.xlane.f32.xlu0 %v635_v34  ;;  %v696_v7 = vsel %vm449_vm1, %v676_v41, 0.0 }
 0x282   :  { %v566_v45 = vmul.f32 0.015625, %v550_v32  ;;  %700 = vadd.xlane.f32.xlu1 %v699_v39  ;;  %v615_v42 = vmul.f32 %v3206_v24, %v3206_v24  ;;  %v679_v11 = vmul.f32 %v3212_v37, %v3212_v37 }
 0x283   :  { %v521_v44 = vpop.xlane.xlu1 %520 }
 0x284   :  { %v3218_v25 = vsub.f32 %v2984_v46, %v566_v45  ;;  %v553_v57 = vadd.f32 %v521_v44, %v473_v26  ;;  %v3224_v5 = vsub.f32 %v3103_v43, %v566_v45  ;;  %v641_v33 = vsel %vm449_vm1, %v615_v42, 0.0  ;;  %v485_v32 = vpop.xlane.xlu0 %484 }
 0x285   :  { %633 = vadd.xlane.f32.xlu0 %v632_v1  ;;  %v705_v16 = vsel %vm449_vm1, %v679_v11, 0.0 }
 0x286   :  { %v569_v29 = vmul.f32 0.015625, %v553_v57  ;;  %697 = vadd.xlane.f32.xlu1 %v696_v7  ;;  %v614_v43 = vmul.f32 %v3218_v25, %v3218_v25  ;;  %v678_v17 = vmul.f32 %v3224_v5, %v3224_v5 }
 0x287   :  { %v518_v13 = vpop.xlane.xlu1 %517 }
 0x288   :  { %v3230_v46 = vsub.f32 %v2991_v50, %v569_v29  ;;  %v552_v26 = vadd.f32 %v518_v13, %v3163_v28  ;;  %v3237_v15 = vsub.f32 %v3109_v48, %v569_v29  ;;  %v638_v20 = vsel %vm449_vm1, %v614_v43, 0.0 }
 0x289   :  { %642 = vadd.xlane.f32.xlu0 %v641_v33  ;;  %v702_v23 = vsel %vm449_vm1, %v678_v17, 0.0 }
 0x28a   :  { %v568_v18 = vmul.f32 0.015625, %v552_v26  ;;  %706 = vadd.xlane.f32.xlu1 %v705_v16  ;;  %v617_v22 = vmul.f32 %v3230_v46, %v3230_v46  ;;  %v681_v27 = vmul.f32 %v3237_v15, %v3237_v15 }
 0x28b   :  { %v527_v50 = vpop.xlane.xlu1 %526 }
 0x28c   :  { %v3243_v28 = vsub.f32 %v2994_v52, %v568_v18  ;;  %v555_v19 = vadd.f32 %v527_v50, %v479_v47  ;;  %v3249_v48 = vsub.f32 %v3111_v49, %v568_v18  ;;  %v647_v39 = vsel %vm449_vm1, %v617_v22, 0.0 }
 0x28d   :  { %639 = vadd.xlane.f32.xlu0 %v638_v20  ;;  %v711_v45 = vsel %vm449_vm1, %v681_v27, 0.0  ;;  %v950_v20 = vld [vmem:[%s3726_s7 + $0x8] sm:$0xff] }
 0x28e   :  { %v571_v40 = vmul.f32 0.015625, %v555_v19  ;;  %703 = vadd.xlane.f32.xlu1 %v702_v23  ;;  %v616_v49 = vmul.f32 %v3243_v28, %v3243_v28  ;;  %v680_v47 = vmul.f32 %v3249_v48, %v3249_v48 }
 0x28f   :  { %v524_v52 = vpop.xlane.xlu1 %523 }
 0x290   :  { %v3255_v34 = vsub.f32 %v3001_v56, %v571_v40  ;;  %v554_v36 = vadd.f32 %v524_v52, %v476_v35  ;;  %v3261_v41 = vsub.f32 %v3117_v54, %v571_v40  ;;  %v644_v1 = vsel %vm449_vm1, %v616_v49, 0.0  ;;  %v488_v54 = vpop.xlane.xlu0 %487  ;;  %v951_v49 = vld [vmem:[%s3726_s7 + $0x10] sm:$0xff] }
 0x291   :  { %648 = vadd.xlane.f32.xlu0 %v647_v39  ;;  %v708_v11 = vsel %vm449_vm1, %v680_v47, 0.0 }
 0x292   :  { %v570_v44 = vmul.f32 0.015625, %v554_v36  ;;  %712 = vadd.xlane.f32.xlu1 %v711_v45  ;;  %v619_v42 = vmul.f32 %v3255_v34, %v3255_v34  ;;  %v683_v29 = vmul.f32 %v3261_v41, %v3261_v41 }
 0x293   :  { %v533_v57 = vpop.xlane.xlu1 %532 }
 0x294   :  { %v3267_v56 = vsub.f32 %v3004_v58, %v570_v44  ;;  %v557_v35 = vadd.f32 %v533_v57, %v485_v32  ;;  %v3273_v7 = vsub.f32 %v3119_v55, %v570_v44  ;;  %v653_v43 = vsel %vm449_vm1, %v619_v42, 0.0  ;;  %v491_v19 = vpop.xlane.xlu0 %490 }
 0x295   :  { %645 = vadd.xlane.f32.xlu0 %v644_v1  ;;  %v717_v17 = vsel %vm449_vm1, %v683_v29, 0.0 }
 0x296   :  { %v573_v13 = vmul.f32 0.015625, %v557_v35  ;;  %709 = vadd.xlane.f32.xlu1 %v708_v11  ;;  %v618_v16 = vmul.f32 %v3267_v56, %v3267_v56  ;;  %v682_v18 = vmul.f32 %v3273_v7, %v3273_v7 }
 0x297   :  { %v530_v58 = vpop.xlane.xlu1 %529 }
 0x298   :  { %v3279_v26 = vsub.f32 %v3011_v62, %v573_v13  ;;  %v556_v33 = vadd.f32 %v530_v58, %v482_v14  ;;  %v3285_v55 = vsub.f32 %v3125_v60, %v573_v13  ;;  %v949_v14 = vld [vmem:[%s3726_s7] sm:$0xff]  ;;  %v650_v23 = vsel %vm449_vm1, %v618_v16, 0.0  ;;  %v494_v35 = vpop.xlane.xlu0 %493 }
 0x299   :  { %654 = vadd.xlane.f32.xlu0 %v653_v43  ;;  %v714_v32 = vsel %vm449_vm1, %v682_v18, 0.0  ;;  %v2628_v36 = vpack.c.bf16 %v950_v20, %v949_v14 }
 0x29a   :  { %v572_v50 = vmul.f32 0.015625, %v556_v33  ;;  %718 = vadd.xlane.f32.xlu1 %v717_v17  ;;  %v621_v27 = vmul.f32 %v3279_v26, %v3279_v26  ;;  %v685_v52 = vmul.f32 %v3285_v55, %v3285_v55 }
 0x29b   :  { %v539_v62 = vpop.xlane.xlu1 %538  ;;  %2629 = vmatprep.subr.bf16.mxu0 %v2628_v36 }
 0x29c   :  { %v3297_v60 = vsub.f32 %v3014_v0, %v572_v50  ;;  %v559_v22 = vadd.f32 %v539_v62, %v491_v19  ;;  %v3303_v40 = vsub.f32 %v3127_v61, %v572_v50  ;;  %v952_v61 = vld [vmem:[%s3726_s7 + $0x18] sm:$0xff]  ;;  %v659_v44 = vsel %vm449_vm1, %v621_v27, 0.0  ;;  %2631 = vmatpush3.bf16.msra.mxu0 %v2628_v36 }
 0x29d   :  { %651 = vadd.xlane.f32.xlu0 %v650_v23  ;;  %v723_v42 = vsel %vm449_vm1, %v685_v52, 0.0  ;;  %v2632_v29 = vpack.c.bf16 %v952_v61, %v951_v49 }
 0x29e   :  { %v575_v39 = vmul.f32 0.015625, %v559_v22  ;;  %715 = vadd.xlane.f32.xlu1 %v714_v32  ;;  %v620_v57 = vmul.f32 %v3297_v60, %v3297_v60  ;;  %v684_v11 = vmul.f32 %v3303_v40, %v3303_v40 }
 0x29f   :  { %v536_v0 = vpop.xlane.xlu1 %535  ;;  %2633 = vmatprep.subr.bf16.mxu0 %v2632_v29 }
 0x2a0   :  { %v3315_v45 = vsub.f32 %v3021_v4, %v575_v39  ;;  %v558_v47 = vadd.f32 %v536_v0, %v488_v54  ;;  %v3321_v1 = vsub.f32 %v3133_v2, %v575_v39  ;;  %v656_v33 = vsel %vm449_vm1, %v620_v57, 0.0  ;;  %2635 = vmatpush3.bf16.msra.mxu0 %v2632_v29  ;;  %v1168_v57 = vld [vmem:[%s3726_s7 + $0x20] sm:$0xff] }
 0x2a1   :  { %660 = vadd.xlane.f32.xlu0 %v659_v44  ;;  %v720_v16 = vsel %vm449_vm1, %v684_v11, 0.0  ;;  %v3373_v44 = vld [vmem:[%s3725_s6] ss:$0 sm:$0xff] }
 0x2a2   :  { %v574_v4 = vmul.f32 0.015625, %v558_v47  ;;  %724 = vadd.xlane.f32.xlu1 %v723_v42  ;;  %v623_v2 = vmul.f32 %v3315_v45, %v3315_v45  ;;  %v687_v17 = vmul.f32 %v3321_v1, %v3321_v1  ;;  %v3387_v11 = vld [vmem:[%s3724_s5] ss:$0 sm:$0xff] }
 0x2a3   :  { %v542_v54 = vpop.xlane.xlu1 %541 }
 0x2a4   :  { %v3327_v13 = vsub.f32 %v3024_v6, %v574_v4  ;;  %v560_v58 = vadd.f32 %v542_v54, %v494_v35  ;;  %v3333_v43 = vsub.f32 %v3135_v3, %v574_v4  ;;  %v497_v6 = vpop.xlane.xlu0 %496  ;;  %v665_v14 = vsel %vm449_vm1, %v623_v2, 0.0  ;;  %v1169_v35 = vld [vmem:[%s3726_s7 + $0x28] sm:$0xff] }
 0x2a5   :  { %657 = vadd.xlane.f32.xlu0 %v656_v33  ;;  %v729_v22 = vsel %vm449_vm1, %v687_v17, 0.0  ;;  %v3382_v42 = vpack.c.bf16 %v1169_v35, %v1168_v57 }
 0x2a6   :  { %v576_v18 = vmul.f32 0.015625, %v560_v58  ;;  %721 = vadd.xlane.f32.xlu1 %v720_v16  ;;  %v622_v3 = vmul.f32 %v3327_v13, %v3327_v13  ;;  %v686_v23 = vmul.f32 %v3333_v43, %v3333_v43 }
 0x2a7   :  { %v545_v50 = vpop.xlane.xlu1 %544  ;;  %2637 = vmatprep.subr.bf16.mxu0 %v3382_v42 }
 0x2a8   :  { %v3339_v19 = vsub.f32 %v3034_v12, %v576_v18  ;;  %v561_v62 = vadd.f32 %v545_v50, %v497_v6  ;;  %v3345_v20 = vsub.f32 %v3143_v9, %v576_v18  ;;  %v662_v32 = vsel %vm449_vm1, %v622_v3, 0.0 }
 0x2a9   :  { %666 = vadd.xlane.f32.xlu0 %v665_v14  ;;  %v726_v9 = vsel %vm449_vm1, %v686_v23, 0.0 }
 0x2aa   :  { %v577_v27 = vmul.f32 0.015625, %v561_v62  ;;  %730 = vadd.xlane.f32.xlu1 %v729_v22  ;;  %v624_v52 = vmul.f32 %v3339_v19, %v3339_v19  ;;  %v688_v39 = vmul.f32 %v3345_v20, %v3345_v20 }
 0x2ac   :  { %v3351_v12 = vsub.f32 %v3031_v10, %v577_v27  ;;  %v3357_v36 = vsub.f32 %v3141_v8, %v577_v27  ;;  %v668_v0 = vsel %vm449_vm1, %v624_v52, 0.0  ;;  %v732_v49 = vsel %vm449_vm1, %v688_v39, 0.0 }
 0x2ad   :  { %663 = vadd.xlane.f32.xlu0 %v662_v32 }
 0x2ae   :  { %727 = vadd.xlane.f32.xlu1 %v726_v9  ;;  %v625_v10 = vmul.f32 %v3351_v12, %v3351_v12  ;;  %v689_v61 = vmul.f32 %v3357_v36, %v3357_v36 }
 0x2b0   :  { %v671_v8 = vsel %vm449_vm1, %v625_v10, 0.0  ;;  %v735_v47 = vsel %vm449_vm1, %v689_v61, 0.0 }
 0x2b1   :  { %669 = vadd.xlane.f32.xlu0 %v668_v0 }
 0x2b2   :  { %733 = vadd.xlane.f32.xlu1 %v732_v49 }
 0x2b5   :  { %672 = vadd.xlane.f32.xlu0 %v671_v8 }
 0x2b6   :  { %736 = vadd.xlane.f32.xlu1 %v735_v47 }
 0x2c7   :  { %897 = vrot.lane.b32.xlu1 %v3373_v44, %s2788_s25 }
 0x2cb   :  { %878 = vrot.lane.b32.xlu0 %v3387_v11, %s2788_s25 }
 0x306   :  { %v631_v29 = vpop.xlane.xlu0 %630 }
 0x307   :  { %v695_v4 = vpop.xlane.xlu1 %694 }
 0x308   :  { %v739_v54 = vadd.f32 %v695_v4, %v631_v29 }
 0x30a   :  { %v755_v58 = vmul.f32 0.015625, %v739_v54  ;;  %v628_v33 = vpop.xlane.xlu0 %627 }
 0x30b   :  { %v692_v2 = vpop.xlane.xlu1 %691 }
 0x30c   :  { %v771_v16 = vadd.f32 1e-05, %v755_v58  ;;  %v738_v17 = vadd.f32 %v692_v2, %v628_v33 }
 0x30e   :  { %2732 = vrsqrt.f32 %v771_v16  ;;  %v754_v18 = vmul.f32 0.015625, %v738_v17  ;;  %v637_v6 = vpop.xlane.xlu0 %636 }
 0x30f   :  { %v701_v50 = vpop.xlane.xlu1 %700 }
 0x310   :  { %v770_v62 = vadd.f32 1e-05, %v754_v18  ;;  %v741_v14 = vadd.f32 %v701_v50, %v637_v6 }
 0x312   :  { %2734 = vrsqrt.f32 %v770_v62  ;;  %v757_v3 = vmul.f32 0.015625, %v741_v14  ;;  %v634_v22 = vpop.xlane.xlu0 %633  ;;  %v1170_v62 = vld [vmem:[%s3726_s7 + $0x30] sm:$0xff] }
 0x313   :  { %v698_v23 = vpop.xlane.xlu1 %697 }
 0x314   :  { %v773_v27 = vadd.f32 1e-05, %v757_v3  ;;  %v740_v32 = vadd.f32 %v698_v23, %v634_v22 }
 0x316   :  { %2736 = vrsqrt.f32 %v773_v27  ;;  %v756_v52 = vmul.f32 0.015625, %v740_v32  ;;  %v643_v9 = vpop.xlane.xlu0 %642 }
 0x317   :  { %v707_v39 = vpop.xlane.xlu1 %706 }
 0x318   :  { %v3391_v0 = vpop.eup %2732  ;;  %v772_v10 = vadd.f32 1e-05, %v756_v52  ;;  %v743_v49 = vadd.f32 %v707_v39, %v643_v9 }
 0x319   :  { %v803_v61 = vmul.f32 %v3391_v0, %v3166_v51 }
 0x31a   :  { %2738 = vrsqrt.f32 %v772_v10  ;;  %v759_v8 = vmul.f32 0.015625, %v743_v49  ;;  %v640_v47 = vpop.xlane.xlu0 %639 }
 0x31b   :  { %v704_v57 = vpop.xlane.xlu1 %703  ;;  %v825_v29 = vmul.f32 %v3387_v11, %v803_v61 }
 0x31c   :  { %v3395_v35 = vpop.eup %2734  ;;  %v775_v4 = vadd.f32 1e-05, %v759_v8  ;;  %v742_v54 = vadd.f32 %v704_v57, %v640_v47 }
 0x31d   :  { %v802_v58 = vmul.f32 %v3395_v35, %v3172_v59  ;;  %v847_v18 = vadd.f32 %v3373_v44, %v825_v29  ;;  %v1171_v59 = vld [vmem:[%s3726_s7 + $0x38] sm:$0xff] }
 0x31e   :  { %2740 = vrsqrt.f32 %v775_v4  ;;  %v758_v33 = vmul.f32 0.015625, %v742_v54  ;;  %v649_v2 = vpop.xlane.xlu0 %648  ;;  %v2640_v52 = vpack.c.bf16 %v1171_v59, %v1170_v62 }
 0x31f   :  { %v713_v16 = vpop.xlane.xlu1 %712  ;;  %v824_v17 = vmul.f32 %v3387_v11, %v802_v58  ;;  %v917_v49 = vmax.f32 %v847_v18, 0.0 }
 0x320   :  { %v3401_v51 = vpop.eup %2736  ;;  %v774_v6 = vadd.f32 1e-05, %v758_v33  ;;  %v745_v50 = vadd.f32 %v713_v16, %v649_v2 }
 0x321   :  { %v846_v14 = vadd.f32 %v3373_v44, %v824_v17  ;;  %v805_v3 = vmul.f32 %v3401_v51, %v3182_v31 }
 0x322   :  { %2742 = vrsqrt.f32 %v774_v6  ;;  %v761_v22 = vmul.f32 0.015625, %v745_v50  ;;  %v646_v23 = vpop.xlane.xlu0 %645 }
 0x323   :  { %v710_v27 = vpop.xlane.xlu1 %709  ;;  %v916_v32 = vmax.f32 %v846_v14, 0.0  ;;  %v827_v61 = vmul.f32 %v3387_v11, %v805_v3 }
 0x324   :  { %v3413_v9 = vpop.eup %2738  ;;  %v777_v39 = vadd.f32 1e-05, %v761_v22  ;;  %v744_v10 = vadd.f32 %v710_v27, %v646_v23 }
 0x325   :  { %2404 = vmatprep.mubr.msk.f32.mxu0 %vm449_vm1, %v916_v32  ;;  %v804_v8 = vmul.f32 %v3413_v9, %v3194_v38  ;;  %v849_v33 = vadd.f32 %v3373_v44, %v827_v61 }
 0x326   :  { %2744 = vrsqrt.f32 %v777_v39  ;;  %v760_v31 = vmul.f32 0.015625, %v744_v10  ;;  %2405 = vmatmul.mubr.msk.f32.vlgmr.msra.gmra.mrb[16].mxu0 %vm449_vm1, %v917_v49  ;;  %v655_v47 = vpop.xlane.xlu0 %654 }
 0x327   :  { %v719_v57 = vpop.xlane.xlu1 %718  ;;  %v826_v29 = vmul.f32 %v3387_v11, %v804_v8  ;;  %2639 = vmatpush3.bf16.msra.mxu0 %v3382_v42  ;;  %v919_v59 = vmax.f32 %v849_v33, 0.0 }
 0x328   :  { %v3422_v4 = vpop.eup %2740  ;;  %v776_v54 = vadd.f32 1e-05, %v760_v31  ;;  %v747_v58 = vadd.f32 %v719_v57, %v655_v47  ;;  %2641 = vmatprep.subr.bf16.mxu0 %v2640_v52 }
 0x329   :  { %v848_v2 = vadd.f32 %v3373_v44, %v826_v29  ;;  %v807_v38 = vmul.f32 %v3422_v4, %v3206_v24 }
 0x32a   :  { %2746 = vrsqrt.f32 %v776_v54  ;;  %v763_v16 = vmul.f32 0.015625, %v747_v58  ;;  %v652_v17 = vpop.xlane.xlu0 %651 }
 0x32b   :  { %v716_v18 = vpop.xlane.xlu1 %715  ;;  %v918_v6 = vmax.f32 %v848_v2, 0.0  ;;  %2643 = vmatpush3.bf16.msra.mxu0 %v2640_v52  ;;  %v829_v14 = vmul.f32 %v3387_v11, %v807_v38 }
 0x32c   :  { %v3428_v50 = vpop.eup %2742  ;;  %v779_v42 = vadd.f32 1e-05, %v763_v16  ;;  %v746_v62 = vadd.f32 %v716_v18, %v652_v17 }
 0x32d   :  { %2407 = vmatprep.mubr.msk.f32.mxu0 %vm449_vm1, %v918_v6  ;;  %v806_v3 = vmul.f32 %v3428_v50, %v3218_v25  ;;  %v851_v10 = vadd.f32 %v3373_v44, %v829_v14 }
 0x32e   :  { %2748 = vrsqrt.f32 %v779_v42  ;;  %v762_v24 = vmul.f32 0.015625, %v746_v62  ;;  %2408 = vmatmul.mubr.msk.f32.gmra.mrb[18].mxu0 %vm449_vm1, %v919_v59  ;;  %v661_v22 = vpop.xlane.xlu0 %660 }
 0x32f   :  { %v725_v23 = vpop.xlane.xlu1 %724  ;;  %v828_v27 = vmul.f32 %v3387_v11, %v806_v3  ;;  %v921_v58 = vmax.f32 %v851_v10, 0.0 }
 0x330   :  { %v3436_v32 = vpop.eup %2744  ;;  %v778_v52 = vadd.f32 1e-05, %v762_v24  ;;  %v749_v39 = vadd.f32 %v725_v23, %v661_v22 }
 0x331   :  { %v850_v49 = vadd.f32 %v3373_v44, %v828_v27  ;;  %v809_v61 = vmul.f32 %v3436_v32, %v3230_v46 }
 0x332   :  { %2750 = vrsqrt.f32 %v778_v52  ;;  %v765_v25 = vmul.f32 0.015625, %v749_v39  ;;  %v658_v8 = vpop.xlane.xlu0 %657 }
 0x333   :  { %v722_v31 = vpop.xlane.xlu1 %721  ;;  %v920_v47 = vmax.f32 %v850_v49, 0.0  ;;  %v831_v33 = vmul.f32 %v3387_v11, %v809_v61 }
 0x334   :  { %v3442_v57 = vpop.eup %2746  ;;  %v781_v29 = vadd.f32 1e-05, %v765_v25  ;;  %v748_v54 = vadd.f32 %v722_v31, %v658_v8 }
 0x335   :  { %2410 = vmatprep.mubr.msk.f32.mxu0 %vm449_vm1, %v920_v47  ;;  %v808_v2 = vmul.f32 %v3442_v57, %v3243_v28  ;;  %v853_v62 = vadd.f32 %v3373_v44, %v831_v33 }
 0x336   :  { %2752 = vrsqrt.f32 %v781_v29  ;;  %v764_v38 = vmul.f32 0.015625, %v748_v54  ;;  %2411 = vmatmul.mubr.msk.f32.gmra.mrb[20].mxu0 %vm449_vm1, %v921_v58  ;;  %v667_v46 = vpop.xlane.xlu0 %666 }
 0x337   :  { %v731_v16 = vpop.xlane.xlu1 %730  ;;  %v830_v17 = vmul.f32 %v3387_v11, %v808_v2  ;;  %v923_v39 = vmax.f32 %v853_v62, 0.0 }
 0x338   :  { %v3450_v18 = vpop.eup %2748  ;;  %v780_v6 = vadd.f32 1e-05, %v764_v38  ;;  %v751_v42 = vadd.f32 %v731_v16, %v667_v46 }
 0x339   :  { %v852_v59 = vadd.f32 %v3373_v44, %v830_v17  ;;  %v811_v14 = vmul.f32 %v3450_v18, %v3255_v34 }
 0x33a   :  { %2754 = vrsqrt.f32 %v780_v6  ;;  %v767_v28 = vmul.f32 0.015625, %v751_v42  ;;  %v664_v3 = vpop.xlane.xlu0 %663 }
 0x33b   :  { %v728_v24 = vpop.xlane.xlu1 %727  ;;  %v922_v22 = vmax.f32 %v852_v59, 0.0  ;;  %v833_v10 = vmul.f32 %v3387_v11, %v811_v14 }
 0x33c   :  { %v3456_v23 = vpop.eup %2750  ;;  %v783_v27 = vadd.f32 1e-05, %v767_v28  ;;  %v750_v52 = vadd.f32 %v728_v24, %v664_v3 }
 0x33d   :  { %2413 = vmatprep.mubr.msk.f32.mxu0 %vm449_vm1, %v922_v22  ;;  %v810_v49 = vmul.f32 %v3456_v23, %v3267_v56  ;;  %v855_v54 = vadd.f32 %v3373_v44, %v833_v10 }
 0x33e   :  { %2756 = vrsqrt.f32 %v783_v27  ;;  %v766_v61 = vmul.f32 0.015625, %v750_v52  ;;  %2414 = vmatmul.mubr.msk.f32.gmra.mrb[22].mxu0 %vm449_vm1, %v923_v39  ;;  %v670_v34 = vpop.xlane.xlu0 %669 }
 0x33f   :  { %v734_v25 = vpop.xlane.xlu1 %733  ;;  %v832_v8 = vmul.f32 %v3387_v11, %v810_v49  ;;  %v925_v42 = vmax.f32 %v855_v54, 0.0 }
 0x340   :  { %v3464_v31 = vpop.eup %2752  ;;  %v782_v47 = vadd.f32 1e-05, %v766_v61  ;;  %v752_v29 = vadd.f32 %v734_v25, %v670_v34 }
 0x341   :  { %v854_v58 = vadd.f32 %v3373_v44, %v832_v8  ;;  %v813_v33 = vmul.f32 %v3464_v31, %v3279_v26 }
 0x342   :  { %2758 = vrsqrt.f32 %v782_v47  ;;  %v768_v56 = vmul.f32 0.015625, %v752_v29  ;;  %v673_v2 = vpop.xlane.xlu0 %672  ;;  %v862_v29 = vmul.f32 %v3395_v35, %v3175_v63  ;;  %v864_v35 = vmul.f32 %v3413_v9, %v3200_v21 }
 0x343   :  { %v737_v38 = vpop.xlane.xlu1 %736  ;;  %v924_v46 = vmax.f32 %v854_v58, 0.0  ;;  %v835_v62 = vmul.f32 %v3387_v11, %v813_v33 }
 0x344   :  { %v3470_v16 = vpop.eup %2754  ;;  %v784_v17 = vadd.f32 1e-05, %v768_v56  ;;  %v753_v6 = vadd.f32 %v737_v38, %v673_v2  ;;  %v863_v2 = vmul.f32 %v3391_v0, %v3169_v53 }
 0x345   :  { %2416 = vmatprep.mubr.msk.f32.mxu0 %vm449_vm1, %v924_v46  ;;  %v812_v59 = vmul.f32 %v3470_v16, %v3297_v60  ;;  %v857_v24 = vadd.f32 %v3373_v44, %v835_v62  ;;  %v866_v62 = vmul.f32 %v3428_v50, %v3224_v5 }
 0x346   :  { %2760 = vrsqrt.f32 %v784_v17  ;;  %v769_v14 = vmul.f32 0.015625, %v753_v6  ;;  %2417 = vmatmul.mubr.msk.f32.gmra.mrb[24].mxu0 %vm449_vm1, %v925_v42  ;;  %v3495_v25 = vpop.permute.xlu0 %878 }
 0x347   :  { %v834_v26 = vmul.f32 %v3387_v11, %v812_v59  ;;  %v927_v60 = vmax.f32 %v857_v24, 0.0  ;;  %v881_v56 = vmul.f32 %v3495_v25, %v862_v29  ;;  %v3508_v38 = vpop.permute.xlu1 %897  ;;  %v882_v6 = vmul.f32 %v3495_v25, %v863_v2 }
 0x348   :  { %v3478_v28 = vpop.eup %2756  ;;  %v785_v3 = vadd.f32 1e-05, %v769_v14  ;;  %v883_v0 = vmul.f32 %v3495_v25, %v864_v35 }
 0x349   :  { %v856_v22 = vadd.f32 %v3373_v44, %v834_v26  ;;  %v815_v27 = vmul.f32 %v3478_v28, %v3315_v45  ;;  %v900_v53 = vadd.f32 %v3508_v38, %v881_v56  ;;  %v901_v9 = vadd.f32 %v3508_v38, %v882_v6  ;;  %v2081_v6 = vld [vmem:[%s3727_s8] ss:$0 sm:$0xff] }
 0x34a   :  { %2762 = vrsqrt.f32 %v785_v3  ;;  %v902_v14 = vadd.f32 %v3508_v38, %v883_v0  ;;  %v885_v26 = vmul.f32 %v3495_v25, %v866_v62  ;;  %v875_v29 = vmul.f32 %v3478_v28, %v3321_v1 }
 0x34b   :  { %v926_v52 = vmax.f32 %v856_v22, 0.0  ;;  %v837_v10 = vmul.f32 %v3387_v11, %v815_v27  ;;  %v932_v59 = vmax.f32 %v900_v53, 0.0  ;;  %v933_v5 = vmax.f32 %v901_v9, 0.0 }
 0x34c   :  { %v3484_v39 = vpop.eup %2758  ;;  %v934_v3 = vmax.f32 %v902_v14, 0.0  ;;  %v904_v24 = vadd.f32 %v3508_v38, %v885_v26 }
 0x34d   :  { %2419 = vmatprep.mubr.msk.f32.mxu0 %vm449_vm1, %v926_v52  ;;  %v814_v49 = vmul.f32 %v3484_v39, %v3327_v13  ;;  %v859_v45 = vadd.f32 %v3373_v44, %v837_v10 }
 0x34e   :  { %2420 = vmatmul.mubr.msk.f32.gmra.mrb[26].mxu0 %vm449_vm1, %v927_v60  ;;  %v936_v52 = vmax.f32 %v904_v24, 0.0 }
 0x34f   :  { %v836_v61 = vmul.f32 %v3387_v11, %v814_v49  ;;  %v929_v33 = vmax.f32 %v859_v45, 0.0  ;;  %v872_v49 = vmul.f32 %v3470_v16, %v3303_v40  ;;  %v874_v40 = vmul.f32 %v3484_v39, %v3333_v43 }
 0x350   :  { %v3492_v34 = vpop.eup %2760 }
 0x351   :  { %v858_v8 = vadd.f32 %v3373_v44, %v836_v61  ;;  %v816_v47 = vmul.f32 %v3492_v34, %v3339_v19  ;;  %v893_v43 = vmul.f32 %v3495_v25, %v874_v40  ;;  %v876_v39 = vmul.f32 %v3492_v34, %v3345_v20 }
 0x353   :  { %v928_v54 = vmax.f32 %v858_v8, 0.0  ;;  %v838_v13 = vmul.f32 %v3387_v11, %v816_v47  ;;  %v891_v8 = vmul.f32 %v3495_v25, %v872_v49  ;;  %v912_v56 = vadd.f32 %v3508_v38, %v893_v43  ;;  %v1562_v43 = vld [vmem:[%s3728_s9 + $0x18] sm:$0xff] }
 0x354   :  { %v3503_v58 = vpop.eup %2762  ;;  %v895_v2 = vmul.f32 %v3495_v25, %v876_v39  ;;  %v1382_v39 = vld [vmem:[%s3721_s2 + $0x8] sm:$0xff] }
 0x355   :  { %2422 = vmatprep.mubr.msk.f32.mxu0 %vm449_vm1, %v928_v54  ;;  %v860_v19 = vadd.f32 %v3373_v44, %v838_v13  ;;  %v817_v63 = vmul.f32 %v3503_v58, %v3351_v12  ;;  %v865_v12 = vmul.f32 %v3401_v51, %v3188_v30  ;;  %v868_v30 = vmul.f32 %v3442_v57, %v3249_v48 }
 0x356   :  { %2423 = vmatmul.mubr.msk.f32.gmra.mrb[28].mxu0 %vm449_vm1, %v929_v33  ;;  %v870_v48 = vmul.f32 %v3456_v23, %v3273_v7  ;;  %v910_v13 = vadd.f32 %v3508_v38, %v891_v8  ;;  %v894_v33 = vmul.f32 %v3495_v25, %v875_v29  ;;  %v877_v1 = vmul.f32 %v3503_v58, %v3357_v36 }
 0x357   :  { %v930_v46 = vmax.f32 %v860_v19, 0.0  ;;  %v839_v17 = vmul.f32 %v3387_v11, %v817_v63  ;;  %v884_v11 = vmul.f32 %v3495_v25, %v865_v12  ;;  %v887_v22 = vmul.f32 %v3495_v25, %v868_v30 }
 0x358   :  { %v889_v10 = vmul.f32 %v3495_v25, %v870_v48  ;;  %v942_v28 = vmax.f32 %v910_v13, 0.0  ;;  %v913_v34 = vadd.f32 %v3508_v38, %v894_v33  ;;  %v896_v19 = vmul.f32 %v3495_v25, %v877_v1  ;;  %v1561_v13 = vld [vmem:[%s3728_s9 + $0x10] sm:$0xff]  ;;  %v1384_v33 = vld [vmem:[%s3721_s2 + $0x18] sm:$0xff]  ;;  %v1385_v1 = vld [vmem:[%s3721_s2 + $0x20] sm:$0xff] }
 0x359   :  { %2425 = vmatprep.mubr.msk.f32.mxu0 %vm449_vm1, %v930_v46  ;;  %v861_v42 = vadd.f32 %v3373_v44, %v839_v17  ;;  %v867_v44 = vmul.f32 %v3422_v4, %v3212_v37  ;;  %v903_v51 = vadd.f32 %v3508_v38, %v884_v11  ;;  %v869_v37 = vmul.f32 %v3436_v32, %v3237_v15 }
 0x35a   :  { %v906_v60 = vadd.f32 %v3508_v38, %v887_v22  ;;  %v871_v15 = vmul.f32 %v3450_v18, %v3261_v41  ;;  %v908_v45 = vadd.f32 %v3508_v38, %v889_v10  ;;  %v873_v41 = vmul.f32 %v3464_v31, %v3285_v55 }
 0x35b   :  { %v931_v21 = vmax.f32 %v861_v42, 0.0  ;;  %v886_v50 = vmul.f32 %v3495_v25, %v867_v44  ;;  %v935_v4 = vmax.f32 %v903_v51, 0.0  ;;  %v888_v27 = vmul.f32 %v3495_v25, %v869_v37 }
 0x35c   :  { %v890_v23 = vmul.f32 %v3495_v25, %v871_v15  ;;  %v938_v61 = vmax.f32 %v906_v60, 0.0  ;;  %v892_v47 = vmul.f32 %v3495_v25, %v873_v41  ;;  %v940_v54 = vmax.f32 %v908_v45, 0.0  ;;  %v1381_v25 = vld [vmem:[%s3721_s2] sm:$0xff] }
 0x35d   :  { %2426 = vmatmul.mubr.msk.f32.gmra.mrb[30].mxu0 %vm449_vm1, %v931_v21  ;;  %v905_v57 = vadd.f32 %v3508_v38, %v886_v50  ;;  %v907_v32 = vadd.f32 %v3508_v38, %v888_v27  ;;  %v944_v63 = vmax.f32 %v912_v56, 0.0  ;;  %v914_v35 = vadd.f32 %v3508_v38, %v895_v2  ;;  %2492 = vmatprep.mubr.f32.mxu1 %v1381_v25  ;;  %v1387_v56 = vld [vmem:[%s3721_s2 + $0x30] sm:$0xff]  ;;  %v1388_v2 = vld [vmem:[%s3721_s2 + $0x38] sm:$0xff]  ;;  %v1796_v25 = vld [vmem:[%s3730_s11 + $0x8] sm:$0xff] }
 0x35e   :  { %2436 = vmatprep.mubr.msk.f32.mxu0 %vm449_vm1, %v932_v59  ;;  %v909_v16 = vadd.f32 %v3508_v38, %v890_v23  ;;  %v911_v31 = vadd.f32 %v3508_v38, %v892_v47  ;;  %v945_v36 = vmax.f32 %v913_v34, 0.0  ;;  %v915_v58 = vadd.f32 %v3508_v38, %v896_v19  ;;  %v1390_v34 = vld [vmem:[%s3721_s2 + $0x48] sm:$0xff]  ;;  %v1391_v19 = vld [vmem:[%s3721_s2 + $0x50] sm:$0xff] }
 0x35f   :  { %v937_v7 = vmax.f32 %v905_v57, 0.0  ;;  %v939_v18 = vmax.f32 %v907_v32, 0.0  ;;  %v946_v46 = vmax.f32 %v914_v35, 0.0  ;;  %v1393_v35 = vld [vmem:[%s3721_s2 + $0x60] sm:$0xff] }
 0x360   :  { %v941_v55 = vmax.f32 %v909_v16, 0.0  ;;  %v943_v20 = vmax.f32 %v911_v31, 0.0  ;;  %v947_v17 = vmax.f32 %v915_v58, 0.0  ;;  %v1560_v16 = vld [vmem:[%s3728_s9 + $0x8] sm:$0xff]  ;;  %v2680_v31 = vpack.c.bf16 %v1562_v43, %v1561_v13  ;;  %v1395_v58 = vld [vmem:[%s3721_s2 + $0x70] sm:$0xff] }
 0x361   :  { %2437 = vmatmul.mubr.msk.f32.vlgmr.msra.gmra.mrb[16].mxu0 %vm449_vm1, %v933_v5 }
 0x362   :  { %2439 = vmatprep.mubr.msk.f32.mxu0 %vm449_vm1, %v934_v3 }
 0x365   :  { %2440 = vmatmul.mubr.msk.f32.gmra.mrb[18].mxu0 %vm449_vm1, %v935_v4 }
 0x366   :  { %2442 = vmatprep.mubr.msk.f32.mxu0 %vm449_vm1, %v936_v52 }
 0x369   :  { %2443 = vmatmul.mubr.msk.f32.gmra.mrb[20].mxu0 %vm449_vm1, %v937_v7 }
 0x36a   :  { %2445 = vmatprep.mubr.msk.f32.mxu0 %vm449_vm1, %v938_v61 }
 0x36d   :  { %2446 = vmatmul.mubr.msk.f32.gmra.mrb[22].mxu0 %vm449_vm1, %v939_v18  ;;  %v1559_v18 = vld [vmem:[%s3728_s9] sm:$0xff] }
 0x36e   :  { %2448 = vmatprep.mubr.msk.f32.mxu0 %vm449_vm1, %v940_v54  ;;  %v2676_v54 = vpack.c.bf16 %v1560_v16, %v1559_v18 }
 0x371   :  { %2449 = vmatmul.mubr.msk.f32.gmra.mrb[24].mxu0 %vm449_vm1, %v941_v55  ;;  %v1383_v55 = vld [vmem:[%s3721_s2 + $0x10] sm:$0xff] }
 0x372   :  { %2451 = vmatprep.mubr.msk.f32.mxu0 %vm449_vm1, %v942_v28  ;;  %v1386_v28 = vld [vmem:[%s3721_s2 + $0x28] sm:$0xff] }
 0x375   :  { %2452 = vmatmul.mubr.msk.f32.gmra.mrb[26].mxu0 %vm449_vm1, %v943_v20  ;;  %v1389_v20 = vld [vmem:[%s3721_s2 + $0x40] sm:$0xff] }
 0x376   :  { %2454 = vmatprep.mubr.msk.f32.mxu0 %vm449_vm1, %v944_v63  ;;  %v1392_v63 = vld [vmem:[%s3721_s2 + $0x58] sm:$0xff] }
 0x379   :  { %2455 = vmatmul.mubr.msk.f32.gmra.mrb[28].mxu0 %vm449_vm1, %v945_v36  ;;  %v1394_v36 = vld [vmem:[%s3721_s2 + $0x68] sm:$0xff] }
 0x37a   :  { %2457 = vmatprep.mubr.msk.f32.mxu0 %vm449_vm1, %v946_v46  ;;  %v1396_v46 = vld [vmem:[%s3721_s2 + $0x78] sm:$0xff] }
 0x37d   :  { %2458 = vmatmul.mubr.msk.f32.gmra.mrb[30].mxu0 %vm449_vm1, %v947_v17  ;;  %v1795_v17 = vld [vmem:[%s3730_s11] sm:$0xff] }
 0x434   :  { %v2438_v53 = vpop.f32.mrb[16].mxu0 }
 0x435   :  { %v2696_v0 = vadd.f32 %v2438_v53, %v2081_v6  ;;  %v1286_v38 = vpop.f32.mrb[17].mxu0  ;;  %v2684_v53 = vpack.c.bf16 %v1796_v25, %v1795_v17 }
 0x436   :  { %v2697_v42 = vadd.f32 %v2081_v6, %v1286_v38 }
 0x437   :  { %2685 = vmatprep.subr.bf16.mxu0 %v2684_v53 }
 0x438   :  { %v2644_v12 = vpack.c.bf16 %v2696_v0, %v2697_v42  ;;  %v2441_v62 = vpop.f32.mrb[18].mxu0  ;;  %v1798_v0 = vld [vmem:[%s3730_s11 + $0x18] sm:$0xff]  ;;  %2687 = vmatpush3.bf16.msra.mxu0 %v2684_v53 }
 0x439   :  { %v2698_v21 = vadd.f32 %v2441_v62, %v2081_v6  ;;  %v1296_v9 = vpop.f32.mrb[19].mxu0 }
 0x43a   :  { %v2699_v11 = vadd.f32 %v2081_v6, %v1296_v9  ;;  %2645 = vmatprep.subr.bf16.mxu1 %v2644_v12 }
 0x43b   :  { %2647 = vmatpush3.bf16.msra.mxu1 %v2644_v12 }
 0x43c   :  { %v2648_v59 = vpack.c.bf16 %v2698_v21, %v2699_v11  ;;  %v2444_v14 = vpop.f32.mrb[20].mxu0 }
 0x43d   :  { %v2700_v26 = vadd.f32 %v2444_v14, %v2081_v6  ;;  %v1306_v44 = vpop.f32.mrb[21].mxu0 }
 0x43e   :  { %v2701_v30 = vadd.f32 %v2081_v6, %v1306_v44  ;;  %2649 = vmatprep.subr.bf16.mxu1 %v2648_v59 }
 0x43f   :  { %2651 = vmatpush3.bf16.msra.mxu1 %v2648_v59 }
 0x440   :  { %v2652_v5 = vpack.c.bf16 %v2700_v26, %v2701_v30  ;;  %v2447_v51 = vpop.f32.mrb[22].mxu0 }
 0x441   :  { %v2702_v50 = vadd.f32 %v2447_v51, %v2081_v6  ;;  %v1316_v3 = vpop.f32.mrb[23].mxu0 }
 0x442   :  { %v2703_v24 = vadd.f32 %v2081_v6, %v1316_v3  ;;  %2653 = vmatprep.subr.bf16.mxu1 %v2652_v5 }
 0x443   :  { %2655 = vmatpush3.bf16.msra.mxu1 %v2652_v5 }
 0x444   :  { %v2656_v22 = vpack.c.bf16 %v2702_v50, %v2703_v24  ;;  %v2450_v37 = vpop.f32.mrb[24].mxu0 }
 0x445   :  { %v2704_v48 = vadd.f32 %v2450_v37, %v2081_v6  ;;  %v1326_v4 = vpop.f32.mrb[25].mxu0 }
 0x446   :  { %v2705_v57 = vadd.f32 %v2081_v6, %v1326_v4  ;;  %2657 = vmatprep.subr.bf16.mxu1 %v2656_v22 }
 0x447   :  { %2659 = vmatpush3.bf16.msra.mxu1 %v2656_v22 }
 0x448   :  { %v2660_v27 = vpack.c.bf16 %v2704_v48, %v2705_v57  ;;  %v2453_v52 = vpop.f32.mrb[26].mxu0 }
 0x449   :  { %v2706_v60 = vadd.f32 %v2453_v52, %v2081_v6  ;;  %v1336_v10 = vpop.f32.mrb[27].mxu0 }
 0x44a   :  { %v2707_v49 = vadd.f32 %v2081_v6, %v1336_v10  ;;  %2661 = vmatprep.subr.bf16.mxu1 %v2660_v27 }
 0x44b   :  { %2663 = vmatpush3.bf16.msra.mxu1 %v2660_v27 }
 0x44c   :  { %v2664_v15 = vpack.c.bf16 %v2706_v60, %v2707_v49  ;;  %v2456_v7 = vpop.f32.mrb[28].mxu0 }
 0x44d   :  { %v2708_v32 = vadd.f32 %v2456_v7, %v2081_v6  ;;  %v1346_v23 = vpop.f32.mrb[29].mxu0 }
 0x44e   :  { %v2709_v61 = vadd.f32 %v2081_v6, %v1346_v23  ;;  %2665 = vmatprep.subr.bf16.mxu1 %v2664_v15 }
 0x44f   :  { %2667 = vmatpush3.bf16.msra.mxu1 %v2664_v15 }
 0x450   :  { %v2668_v45 = vpack.c.bf16 %v2708_v32, %v2709_v61  ;;  %v2459_v8 = vpop.f32.mrb[30].mxu0 }
 0x451   :  { %v2710_v40 = vadd.f32 %v2459_v8, %v2081_v6  ;;  %v1356_v41 = vpop.f32.mrb[31].mxu0  ;;  %v2114_v8 = vld [vmem:[%s3729_s10] ss:$0 sm:$0xff] }
 0x452   :  { %v2711_v47 = vadd.f32 %v2081_v6, %v1356_v41  ;;  %2669 = vmatprep.subr.bf16.mxu1 %v2668_v45  ;;  %v1797_v6 = vld [vmem:[%s3730_s11 + $0x10] sm:$0xff] }
 0x453   :  { %2671 = vmatpush3.bf16.msra.mxu1 %v2668_v45  ;;  %v2688_v38 = vpack.c.bf16 %v1798_v0, %v1797_v6 }
 0x454   :  { %v2672_v29 = vpack.c.bf16 %v2710_v40, %v2711_v47 }
 0x455   :  { %2689 = vmatprep.subr.bf16.mxu0 %v2688_v38 }
 0x456   :  { %2673 = vmatprep.subr.bf16.mxu1 %v2672_v29  ;;  %2691 = vmatpush3.bf16.msra.mxu0 %v2688_v38 }
 0x457   :  { %2675 = vmatpush3.bf16.msra.mxu1 %v2672_v29 }
 0x458   :  { %2677 = vmatprep.subr.bf16.mxu1 %v2676_v54 }
 0x45a   :  { %2493 = vmatmul.mubr.f32.vlgmr.msra.gmra.mrb[16].mxu1 %v1382_v39 }
 0x45b   :  { %2495 = vmatprep.mubr.f32.mxu1 %v1383_v55  ;;  %2679 = vmatpush3.bf16.msra.mxu1 %v2676_v54 }
 0x45c   :  { %2681 = vmatprep.subr.bf16.mxu1 %v2680_v31 }
 0x45e   :  { %2496 = vmatmul.mubr.f32.gmra.mrb[18].mxu1 %v1384_v33 }
 0x45f   :  { %2498 = vmatprep.mubr.f32.mxu1 %v1385_v1  ;;  %2683 = vmatpush3.bf16.msra.mxu1 %v2680_v31 }
 0x460   :  { %2692 = vmatprep.subr.bf16.mxu1 %v2684_v53 }
 0x462   :  { %2499 = vmatmul.mubr.f32.gmra.mrb[20].mxu1 %v1386_v28 }
 0x463   :  { %2501 = vmatprep.mubr.f32.mxu1 %v1387_v56 }
 0x466   :  { %2502 = vmatmul.mubr.f32.gmra.mrb[22].mxu1 %v1388_v2 }
 0x467   :  { %2504 = vmatprep.mubr.f32.mxu1 %v1389_v20 }
 0x46a   :  { %2505 = vmatmul.mubr.f32.gmra.mrb[24].mxu1 %v1390_v34 }
 0x46b   :  { %2507 = vmatprep.mubr.f32.mxu1 %v1391_v19 }
 0x46e   :  { %2508 = vmatmul.mubr.f32.gmra.mrb[26].mxu1 %v1392_v63 }
 0x46f   :  { %2510 = vmatprep.mubr.f32.mxu1 %v1393_v35 }
 0x472   :  { %2511 = vmatmul.mubr.f32.gmra.mrb[28].mxu1 %v1394_v36 }
 0x473   :  { %2513 = vmatprep.mubr.f32.mxu1 %v1395_v58 }
 0x476   :  { %2514 = vmatmul.mubr.f32.gmra.mrb[30].mxu1 %v1396_v46 }
 0x52d   :  { %v2494_v42 = vpop.f32.mrb[16].mxu1 }
 0x52e   :  { %v1463_v12 = vpop.f32.mrb[17].mxu1  ;;  %v1543_v21 = vmax.f32 %v2494_v42, 0.0 }
 0x52f   :  { %v1542_v62 = vmax.f32 %v1463_v12, 0.0 }
 0x531   :  { %v2497_v9 = vpop.f32.mrb[18].mxu1  ;;  %2524 = vmatprep.mubr.msk.f32.mxu1 %vm449_vm1, %v1542_v62 }
 0x532   :  { %v1473_v11 = vpop.f32.mrb[19].mxu1  ;;  %2525 = vmatmul.mubr.msk.f32.vlgmr.msra.gmra.mrb[32].mxu1 %vm449_vm1, %v1543_v21  ;;  %v1545_v14 = vmax.f32 %v2497_v9, 0.0 }
 0x533   :  { %v1544_v59 = vmax.f32 %v1473_v11, 0.0  ;;  %2694 = vmatpush3.bf16.msra.mxu1 %v2684_v53 }
 0x534   :  { %2693 = vmatprep.subr.bf16.mxu1 %v2688_v38 }
 0x535   :  { %v2500_v26 = vpop.f32.mrb[20].mxu1  ;;  %2527 = vmatprep.mubr.msk.f32.mxu1 %vm449_vm1, %v1544_v59 }
 0x536   :  { %v1483_v44 = vpop.f32.mrb[21].mxu1  ;;  %2528 = vmatmul.mubr.msk.f32.gmra.mrb[34].mxu1 %vm449_vm1, %v1545_v14  ;;  %v1547_v5 = vmax.f32 %v2500_v26, 0.0 }
 0x537   :  { %v1546_v30 = vmax.f32 %v1483_v44, 0.0  ;;  %2695 = vmatpush3.bf16.msra.mxu1 %v2688_v38 }
 0x539   :  { %v2503_v51 = vpop.f32.mrb[22].mxu1  ;;  %2530 = vmatprep.mubr.msk.f32.mxu1 %vm449_vm1, %v1546_v30 }
 0x53a   :  { %v1493_v50 = vpop.f32.mrb[23].mxu1  ;;  %2531 = vmatmul.mubr.msk.f32.gmra.mrb[36].mxu1 %vm449_vm1, %v1547_v5  ;;  %v1549_v24 = vmax.f32 %v2503_v51, 0.0 }
 0x53b   :  { %v1548_v3 = vmax.f32 %v1493_v50, 0.0 }
 0x53d   :  { %v2506_v22 = vpop.f32.mrb[24].mxu1  ;;  %2533 = vmatprep.mubr.msk.f32.mxu1 %vm449_vm1, %v1548_v3 }
 0x53e   :  { %v1503_v37 = vpop.f32.mrb[25].mxu1  ;;  %2534 = vmatmul.mubr.msk.f32.gmra.mrb[38].mxu1 %vm449_vm1, %v1549_v24  ;;  %v1551_v4 = vmax.f32 %v2506_v22, 0.0 }
 0x53f   :  { %v1550_v48 = vmax.f32 %v1503_v37, 0.0  ;;  %v2131_v37 = vld [vmem:[%s3731_s12] ss:$0 sm:$0xff]  ;;  %s2789_s12 = smov [#allocation2]  }
 0x540   :  { %s2035_s29 = sshll.u32 %s2789_s12, 4  ;;  %s2036_s29 = int_to_ptr.vmem [resolvable:$true] %s2035_s29 }
 0x541   :  { %v2509_v57 = vpop.f32.mrb[26].mxu1  ;;  %2536 = vmatprep.mubr.msk.f32.mxu1 %vm449_vm1, %v1550_v48  ;;  %s2764_s7 = scalar_lea.vmem %s2036_s29, 2048  ;;  %p2769_p1 = scmp.lt.s32.totalorder %s2036_s29, %s2036_s29 }
 0x542   :  { %v1513_v27 = vpop.f32.mrb[27].mxu1  ;;  %2537 = vmatmul.mubr.msk.f32.gmra.mrb[40].mxu1 %vm449_vm1, %v1551_v4  ;;  %v1553_v60 = vmax.f32 %v2509_v57, 0.0  ;;  %p2765_p0 = scmp.ne.s32.totalorder %s2036_s29, %s2764_s7  ;;  %p2770_p2 = scmp.lt.s32.totalorder %s2764_s7, %s2764_s7 }
 0x543   :  { %v1552_v52 = vmax.f32 %v1513_v27, 0.0 }
 0x544   :  { %p2771_p3 = por %p2770_p2, %p2769_p1 }
 0x545   :  { %v2512_v10 = vpop.f32.mrb[28].mxu1  ;;  %2539 = vmatprep.mubr.msk.f32.mxu1 %vm449_vm1, %v1552_v52 }
 0x546   :  { %v1523_v49 = vpop.f32.mrb[29].mxu1  ;;  %2540 = vmatmul.mubr.msk.f32.gmra.mrb[42].mxu1 %vm449_vm1, %v1553_v60  ;;  %v1555_v7 = vmax.f32 %v2512_v10, 0.0  ;;  %p2772_p4 = pnand %p2771_p3, %p2765_p0 }
 0x547   :  { %v1554_v15 = vmax.f32 %v1523_v49, 0.0 }
 0x549   :  { %v2515_v32 = vpop.f32.mrb[30].mxu1  ;;  %2542 = vmatprep.mubr.msk.f32.mxu1 %vm449_vm1, %v1554_v15 }
 0x54a   :  { %v1533_v23 = vpop.f32.mrb[31].mxu1  ;;  %2543 = vmatmul.mubr.msk.f32.gmra.mrb[44].mxu1 %vm449_vm1, %v1555_v7  ;;  %v1557_v45 = vmax.f32 %v2515_v32, 0.0 }
 0x54b   :  { %v1556_v61 = vmax.f32 %v1533_v23, 0.0 }
 0x54d   :  { %2545 = vmatprep.mubr.msk.f32.mxu1 %vm449_vm1, %v1556_v61 }
 0x54e   :  { %2546 = vmatmul.mubr.msk.f32.gmra.mrb[46].mxu1 %vm449_vm1, %v1557_v45 }
 0x605   :  { %v2526_v40 = vpop.f32.mrb[32].mxu1 }
 0x606   :  { %v1763_v41 = vadd.f32 %v2526_v40, %v2114_v8  ;;  %v1677_v18 = vpop.f32.mrb[33].mxu1 }
 0x607   :  { %v1762_v16 = vadd.f32 %v2114_v8, %v1677_v18 }
 0x608   :  { %v1779_v54 = vmax.f32 %v1763_v41, 0.0 }
 0x609   :  { %v1778_v47 = vmax.f32 %v1762_v16, 0.0  ;;  %v2529_v29 = vpop.f32.mrb[34].mxu1 }
 0x60a   :  { %v1765_v13 = vadd.f32 %v2529_v29, %v2114_v8  ;;  %v1687_v43 = vpop.f32.mrb[35].mxu1 }
 0x60b   :  { %v1764_v39 = vadd.f32 %v2114_v8, %v1687_v43  ;;  %2556 = vmatprep.mubr.msk.f32.mxu0 %vm449_vm1, %v1778_v47 }
 0x60c   :  { %2557 = vmatmul.mubr.msk.f32.vlgmr.msra.gmra.mrb[32].mxu0 %vm449_vm1, %v1779_v54  ;;  %v1781_v33 = vmax.f32 %v1765_v13, 0.0 }
 0x60d   :  { %v1780_v55 = vmax.f32 %v1764_v39, 0.0  ;;  %v2532_v31 = vpop.f32.mrb[36].mxu1 }
 0x60e   :  { %v1767_v1 = vadd.f32 %v2532_v31, %v2114_v8  ;;  %v1697_v28 = vpop.f32.mrb[37].mxu1 }
 0x60f   :  { %v1766_v56 = vadd.f32 %v2114_v8, %v1697_v28  ;;  %2559 = vmatprep.mubr.msk.f32.mxu0 %vm449_vm1, %v1780_v55 }
 0x610   :  { %2560 = vmatmul.mubr.msk.f32.gmra.mrb[34].mxu0 %vm449_vm1, %v1781_v33  ;;  %v1783_v34 = vmax.f32 %v1767_v1, 0.0 }
 0x611   :  { %v1782_v2 = vmax.f32 %v1766_v56, 0.0  ;;  %v2535_v20 = vpop.f32.mrb[38].mxu1 }
 0x612   :  { %v1769_v19 = vadd.f32 %v2535_v20, %v2114_v8  ;;  %v1707_v63 = vpop.f32.mrb[39].mxu1 }
 0x613   :  { %v1768_v35 = vadd.f32 %v2114_v8, %v1707_v63  ;;  %2562 = vmatprep.mubr.msk.f32.mxu0 %vm449_vm1, %v1782_v2 }
 0x614   :  { %2563 = vmatmul.mubr.msk.f32.gmra.mrb[36].mxu0 %vm449_vm1, %v1783_v34  ;;  %v1785_v46 = vmax.f32 %v1769_v19, 0.0 }
 0x615   :  { %v1784_v36 = vmax.f32 %v1768_v35, 0.0  ;;  %v2538_v58 = vpop.f32.mrb[40].mxu1 }
 0x616   :  { %v1771_v17 = vadd.f32 %v2538_v58, %v2114_v8  ;;  %v1717_v25 = vpop.f32.mrb[41].mxu1 }
 0x617   :  { %v1770_v6 = vadd.f32 %v2114_v8, %v1717_v25  ;;  %2565 = vmatprep.mubr.msk.f32.mxu0 %vm449_vm1, %v1784_v36 }
 0x618   :  { %2566 = vmatmul.mubr.msk.f32.gmra.mrb[38].mxu0 %vm449_vm1, %v1785_v46  ;;  %v1787_v38 = vmax.f32 %v1771_v17, 0.0 }
 0x619   :  { %v1786_v53 = vmax.f32 %v1770_v6, 0.0  ;;  %v2541_v0 = vpop.f32.mrb[42].mxu1 }
 0x61a   :  { %v1773_v42 = vadd.f32 %v2541_v0, %v2114_v8  ;;  %v1727_v12 = vpop.f32.mrb[43].mxu1 }
 0x61b   :  { %v1772_v62 = vadd.f32 %v2114_v8, %v1727_v12  ;;  %2568 = vmatprep.mubr.msk.f32.mxu0 %vm449_vm1, %v1786_v53 }
 0x61c   :  { %2569 = vmatmul.mubr.msk.f32.gmra.mrb[40].mxu0 %vm449_vm1, %v1787_v38  ;;  %v1789_v11 = vmax.f32 %v1773_v42, 0.0 }
 0x61d   :  { %v1788_v21 = vmax.f32 %v1772_v62, 0.0  ;;  %v2544_v9 = vpop.f32.mrb[44].mxu1 }
 0x61e   :  { %v1775_v59 = vadd.f32 %v2544_v9, %v2114_v8  ;;  %v1737_v14 = vpop.f32.mrb[45].mxu1 }
 0x61f   :  { %v1774_v26 = vadd.f32 %v2114_v8, %v1737_v14  ;;  %2571 = vmatprep.mubr.msk.f32.mxu0 %vm449_vm1, %v1788_v21 }
 0x620   :  { %2572 = vmatmul.mubr.msk.f32.gmra.mrb[42].mxu0 %vm449_vm1, %v1789_v11  ;;  %v1791_v5 = vmax.f32 %v1775_v59, 0.0 }
 0x621   :  { %v1790_v44 = vmax.f32 %v1774_v26, 0.0  ;;  %v2547_v30 = vpop.f32.mrb[46].mxu1 }
 0x622   :  { %v1777_v51 = vadd.f32 %v2547_v30, %v2114_v8  ;;  %v1747_v50 = vpop.f32.mrb[47].mxu1 }
 0x623   :  { %v1776_v3 = vadd.f32 %v2114_v8, %v1747_v50  ;;  %2574 = vmatprep.mubr.msk.f32.mxu1 %vm449_vm1, %v1790_v44 }
 0x624   :  { %2575 = vmatmul.mubr.msk.f32.vlgmr.msra.gmra.mrb[48].mxu1 %vm449_vm1, %v1791_v5  ;;  %v1793_v22 = vmax.f32 %v1777_v51, 0.0 }
 0x625   :  { %v1792_v24 = vmax.f32 %v1776_v3, 0.0 }
 0x627   :  { %2577 = vmatprep.mubr.msk.f32.mxu1 %vm449_vm1, %v1792_v24 }
 0x628   :  { %2578 = vmatmul.mubr.msk.f32.gmra.mrb[50].mxu1 %vm449_vm1, %v1793_v22 }
 0x6df   :  { %v2558_v48 = vpop.f32.mrb[32].mxu0 }
 0x6e0   :  { %v1999_v4 = vadd.f32 %v2558_v48, %v2131_v37  ;;  %v1913_v57 = vpop.f32.mrb[33].mxu0 }
 0x6e1   :  { %v1998_v27 = vadd.f32 %v2131_v37, %v1913_v57 }
 0x6e2   :  { %2015 = vst [vmem:[#allocation2 + $0x8] sm:$0xff] %v1999_v4 }
 0x6e3   :  { %2014 = vst [vmem:[#allocation2] sm:$0xff] %v1998_v27  ;;  %v2561_v52 = vpop.f32.mrb[34].mxu0 }
 0x6e4   :  { %v2001_v60 = vadd.f32 %v2561_v52, %v2131_v37  ;;  %v1923_v10 = vpop.f32.mrb[35].mxu0 }
 0x6e5   :  { %v2000_v49 = vadd.f32 %v2131_v37, %v1923_v10 }
 0x6e6   :  { %2017 = vst [vmem:[#allocation2 + $0x18] sm:$0xff] %v2001_v60 }
 0x6e7   :  { %2016 = vst [vmem:[#allocation2 + $0x10] sm:$0xff] %v2000_v49  ;;  %v2564_v15 = vpop.f32.mrb[36].mxu0 }
 0x6e8   :  { %v2003_v7 = vadd.f32 %v2564_v15, %v2131_v37  ;;  %v1933_v32 = vpop.f32.mrb[37].mxu0 }
 0x6e9   :  { %v2002_v23 = vadd.f32 %v2131_v37, %v1933_v32 }
 0x6ea   :  { %2019 = vst [vmem:[#allocation2 + $0x28] sm:$0xff] %v2003_v7 }
 0x6eb   :  { %2018 = vst [vmem:[#allocation2 + $0x20] sm:$0xff] %v2002_v23  ;;  %v2567_v61 = vpop.f32.mrb[38].mxu0 }
 0x6ec   :  { %v2005_v45 = vadd.f32 %v2567_v61, %v2131_v37  ;;  %v1943_v8 = vpop.f32.mrb[39].mxu0 }
 0x6ed   :  { %v2004_v40 = vadd.f32 %v2131_v37, %v1943_v8 }
 0x6ee   :  { %2021 = vst [vmem:[#allocation2 + $0x38] sm:$0xff] %v2005_v45 }
 0x6ef   :  { %2020 = vst [vmem:[#allocation2 + $0x30] sm:$0xff] %v2004_v40  ;;  %v2570_v41 = vpop.f32.mrb[40].mxu0 }
 0x6f0   :  { %v2007_v18 = vadd.f32 %v2570_v41, %v2131_v37  ;;  %v1953_v16 = vpop.f32.mrb[41].mxu0 }
 0x6f1   :  { %v2006_v47 = vadd.f32 %v2131_v37, %v1953_v16 }
 0x6f2   :  { %2023 = vst [vmem:[#allocation2 + $0x48] sm:$0xff] %v2007_v18 }
 0x6f3   :  { %2022 = vst [vmem:[#allocation2 + $0x40] sm:$0xff] %v2006_v47  ;;  %v2573_v29 = vpop.f32.mrb[42].mxu0 }
 0x6f4   :  { %v2009_v54 = vadd.f32 %v2573_v29, %v2131_v37  ;;  %v1963_v13 = vpop.f32.mrb[43].mxu0 }
 0x6f5   :  { %v2008_v43 = vadd.f32 %v2131_v37, %v1963_v13 }
 0x6f6   :  { %2025 = vst [vmem:[#allocation2 + $0x58] sm:$0xff] %v2009_v54 }
 0x6f7   :  { %2024 = vst [vmem:[#allocation2 + $0x50] sm:$0xff] %v2008_v43  ;;  %v2576_v39 = vpop.f32.mrb[48].mxu1 }
 0x6f8   :  { %v2011_v55 = vadd.f32 %v2576_v39, %v2131_v37  ;;  %v1973_v31 = vpop.f32.mrb[49].mxu1 }
 0x6f9   :  { %v2010_v33 = vadd.f32 %v2131_v37, %v1973_v31 }
 0x6fa   :  { %2027 = vst [vmem:[#allocation2 + $0x68] sm:$0xff] %v2011_v55 }
 0x6fb   :  { %2026 = vst [vmem:[#allocation2 + $0x60] sm:$0xff] %v2010_v33  ;;  %v2579_v1 = vpop.f32.mrb[50].mxu1 }
 0x6fc   :  { %v2013_v28 = vadd.f32 %v2579_v1, %v2131_v37  ;;  %v1983_v56 = vpop.f32.mrb[51].mxu1 }
 0x6fd   :  { %v2012_v2 = vadd.f32 %v2131_v37, %v1983_v56 }
 0x6fe   :  { %2029 = vst [vmem:[#allocation2 + $0x78] sm:$0xff] %v2013_v28 }
 0x6ff   :  { %2028 = vst [vmem:[#allocation2 + $0x70] sm:$0xff] %v2012_v2 }
 0x700   :  { %2775 = shalt.err (!%p2772_p4)
}
 0x701   :  { %s2776_s1 = scalar_lea.hbm %s3732_s13, 2048 }
 0x702   :  { %p2777_p5 = scmp.ne.s32.totalorder %s3732_s13, %s2776_s1  ;;  %p2780_p6 = scmp.lt.u32.totalorder %s2776_s1, %s3732_s13 }
 0x704   :  { %p2782_p7 = pnand %p2780_p6, %p2777_p5 }
 0x706   :  { %2785 = shalt.err (!%p2782_p7)
}
 0x707   :  { %s2790_s17 = smov 128   ;;  %s2791_s18 = smov 8  }
 0x708   :  { %2041 = dma.vmem_to_hbm [thread:$0]  %s2036_s29, 2048, %s3732_s13, [#allocation3], %s2790_s17, %s2790_s17, %s2791_s18  }
 0x709   :  { %2786 = dma.done.wait [#allocation3], 2048  }
 0x70a   :  { %2787 = vsyncadd [#allocation3], 4294965248 }
 0x70b   :  { %2045 = vsyncpa [#allocation3], 1 }

</bundles_post_ra>
